<compile_context>
chip_gen: v7x
topology: tpu7x:2x2x1
jax: 0.10.0
libtpu: 0.0.40
codegen_flags: <defaults>
</compile_context>

<pallas_src>
import jax
import jax.numpy as jnp
import numpy as np
from jax import lax
from jax.experimental import pallas as pl
from jax.experimental.pallas import tpu as pltpu

PAD = {"conv_1": (3, 4), "pool_1": (2, 2), "conv_2": (1, 2), "pool_2": (0, 1)}
NEG_SLOPE = 0.01     # PyTorch LeakyReLU default
BN_EPS = 0.001
C = 128              # channel count after conv_1
K2 = 4               # conv_2..4 kernel size
KC = K2 * C          # im2col contraction per conv_2..4 layer (512)


def _leaky(y):
    return jnp.where(y >= 0.0, y, NEG_SLOPE * y)


def _vmem():
    return pl.BlockSpec(memory_space=pltpu.MemorySpace.VMEM)


# ----------------------------------------------------------------------------
# Fused kernel: conv_1 -> pool_1 -> conv_2 -> conv_3 -> conv_4 -> pool_2 -> fc
# ----------------------------------------------------------------------------
def _make_kernel(n, k1, t1, t2, t3, t4):
    pl_p1 = PAD["pool_1"][0]   # 2
    pl_c2 = PAD["conv_2"][0]   # 1

    def kernel(x_ref, pa_ref, pb_ref, o_ref, apad):
        # ---- conv_1: padded+broadcast input (N, 24, 128); 8 lane-dense taps,
        #      VPU FMAs (Cin=1, K=8 would badly underfill the MXU), then
        #      folded-BN + LeakyReLU, all in f32.
        acc = None
        for j in range(k1):
            term = x_ref[:, j:j + t1, :] * pa_ref[j:j + 1, :]
            acc = term if acc is None else acc + term
        y1 = _leaky(acc * pa_ref[k1:k1 + 1, :] + pa_ref[k1 + 1:k1 + 2, :])

        # ---- pool_1: ConstantPad1d(2,2) + MaxPool1d(4,4)  (Dropout = identity)
        # Pooled rows are written bf16, time-major, straight into the conv_2
        # input buffer; pad rows are zeroed once and stay zero for all 3 convs.
        apad[...] = jnp.zeros(apad.shape, apad.dtype)
        for t in range(t2):
            idxs = [i for i in range(4 * t - pl_p1, 4 * t - pl_p1 + 4)
                    if 0 <= i < t1]
            m = y1[:, idxs[0], :]
            for i in idxs[1:]:
                m = jnp.maximum(m, y1[:, i, :])
            if len(idxs) < 4:                    # zero pad participates in max
                m = jnp.maximum(m, 0.0)
            apad[(pl_c2 + t) * n:(pl_c2 + t + 1) * n, :] = m.astype(jnp.bfloat16)

        # ---- conv_2 / conv_3 / conv_4: pad(1,2) + Conv1d(128->128, k=4)
        #      + folded BN + LeakyReLU.  im2col = 4 contiguous slab reads +
        #      lane concat -> ONE bf16 MXU matmul per layer (f32 accumulate).
        y = None
        for li in range(3):
            col = jnp.concatenate(
                [apad[j * n: j * n + t3 * n, :] for j in range(K2)], axis=1)
            y = jnp.dot(col, pb_ref[li * KC:(li + 1) * KC, :],
                        preferred_element_type=jnp.float32)     # (t3*n, 128)
            y = _leaky(y * pa_ref[k1 + 2 + li:k1 + 3 + li, :]
                       + pa_ref[k1 + 5 + li:k1 + 6 + li, :])
            if li < 2:   # write back as (still zero-padded) input of next conv
                apad[pl_c2 * n: pl_c2 * n + t3 * n, :] = y.astype(jnp.bfloat16)

        # ---- pool_2 (pad(0,1) + MaxPool1d(3,3)) + Flatten + Linear, fused
        # into ONE matmul.  Torch's channel-major flatten is folded into the
        # time-major FC weight row order at parameter-build time.
        pooled = []
        for t in range(t4):
            idxs = [i for i in range(3 * t, 3 * t + 3) if i < t3]
            m = y[idxs[0] * n:(idxs[0] + 1) * n, :]
            for i in idxs[1:]:
                m = jnp.maximum(m, y[i * n:(i + 1) * n, :])
            if len(idxs) < 3:                    # right zero pad joins the max
                m = jnp.maximum(m, 0.0)
            pooled.append(m)
        flat = jnp.concatenate(pooled, axis=1).astype(jnp.bfloat16)  # (N, 256)
        out = jnp.dot(flat, pb_ref[3 * KC:3 * KC + t4 * C, :],
                      preferred_element_type=jnp.float32)            # (N, 128)
        o_ref[...] = out + pa_ref[k1 + 8:k1 + 9, :]   # bias (zero-padded lanes)

    return kernel


# ----------------------------------------------------------------------------
# Wrapper: one pallas_call for the whole forward pass
# ----------------------------------------------------------------------------
def tinysleepnet_forward(x_ncw, p):
    """x_ncw: PyTorch NCW input (N, 1, L).  Returns (N, n_classes) logits."""
    x = jnp.transpose(x_ncw, (0, 2, 1)).astype(jnp.float32)      # (N, L, 1)
    n, l, _ = x.shape
    k1 = p["w1"].shape[2]                                        # 8
    n_cls = p["fc_w"].shape[0]

    t1p = l + sum(PAD["conv_1"])                                 # 23
    t1 = t1p - k1 + 1                                            # 16 (stride 1)
    t2 = (t1 + sum(PAD["pool_1"]) - 4) // 4 + 1                  # 5
    t2p = t2 + sum(PAD["conv_2"])                                # 8
    t3 = t2p - K2 + 1                                            # 5
    t4 = (t3 + sum(PAD["pool_2"]) - 3) // 3 + 1                  # 2

    # ConstantPad1d(conv_1) + 128-lane broadcast done once here so the kernel's
    # conv_1 tap reads are lane-dense.  Time axis rounded up to 8 sublanes; the
    # extra zero rows are never read.
    t1p8 = -(-t1p // 8) * 8                                      # 24
    xp = jnp.pad(x[:, :, 0],
                 ((0, 0), (PAD["conv_1"][0], t1p8 - l - PAD["conv_1"][0])))
    xb = jnp.broadcast_to(xp[:, :, None], (n, t1p8, C))

    # TODO(synk): for non-toy batch sizes add a batch grid axis with
    #             dimension_semantics=("parallel",); at N=2 a grid would only
    #             add per-step overhead.
    out = pl.pallas_call(
        _make_kernel(n, k1, t1, t2, t3, t4),
        out_shape=jax.ShapeDtypeStruct((n, C), jnp.float32),
        in_specs=[_vmem(), _vmem(), _vmem()],
        out_specs=_vmem(),
        scratch_shapes=[
            pltpu.VMEM((t2p * n, C), jnp.bfloat16),   # conv_2..4 padded acts
        ],
    )(xb, p["pA"], p["pB"])
    return out[:, :n_cls]


# ----------------------------------------------------------------------------
# Pure-JAX reference (independent: lax.conv in NCW layout, torch weight layout,
# f32 HIGHEST precision)
# ----------------------------------------------------------------------------
def ref_forward(x_ncw, p):
    def conv_block(x, w, scale, shift, pad):
        x = jnp.pad(x, ((0, 0), (0, 0), (pad[0], pad[1])))
        y = lax.conv_general_dilated(
            x, w, window_strides=(1,), padding="VALID",
            dimension_numbers=("NCH", "OIH", "NCH"),
            precision=lax.Precision.HIGHEST)
        return _leaky(y * scale[None, :, None] + shift[None, :, None])

    def mp(x, pad, k):
        x = jnp.pad(x, ((0, 0), (0, 0), (pad[0], pad[1])))
        t = (x.shape[-1] - k) // k + 1
        return jnp.max(x[..., : t * k].reshape(x.shape[0], x.shape[1], t, k),
                       axis=-1)

    x = conv_block(x_ncw, p["w1"], p["scale1"], p["shift1"], PAD["conv_1"])
    x = mp(x, PAD["pool_1"], 4)
    x = conv_block(x, p["w2"], p["scale2"], p["shift2"], PAD["conv_2"])
    x = conv_block(x, p["w3"], p["scale3"], p["shift3"], PAD["conv_2"])
    x = conv_block(x, p["w4"], p["scale4"], p["shift4"], PAD["conv_2"])
    x = mp(x, PAD["pool_2"], 3)
    flat = x.reshape(x.shape[0], -1)          # channel-major flatten (N, C, T)
    return jnp.dot(flat, p["fc_w"].T, precision=lax.Precision.HIGHEST) + p["fc_b"]


# ----------------------------------------------------------------------------
# Deterministic parameter construction (torch layouts + packed kernel slabs)
# ----------------------------------------------------------------------------
def make_params(key, fs=32, input_len=16, n_classes=3):
    first_k = int(fs / 4.0)          # 8
    first_stride = int(fs / 32.0)    # 1
    assert first_stride == 1, "kernel assumes fs == 32 (first conv stride 1)"

    ks = jax.random.split(key, 32)
    ki = iter(ks)

    def bn(c):
        gamma = 1.0 + 0.1 * jax.random.normal(next(ki), (c,), jnp.float32)
        beta = 0.1 * jax.random.normal(next(ki), (c,), jnp.float32)
        mean = 0.1 * jax.random.normal(next(ki), (c,), jnp.float32)
        var = 0.5 + jax.random.uniform(next(ki), (c,), jnp.float32)
        scale = gamma / jnp.sqrt(var + BN_EPS)
        shift = beta - mean * scale
        return scale, shift

    p = {}
    # torch layouts: Conv1d weight (Cout, Cin, k), Linear weight (out, in)
    p["w1"] = 0.1 * jax.random.normal(next(ki), (C, 1, first_k), jnp.float32)
    p["scale1"], p["shift1"] = bn(C)
    for name in ("2", "3", "4"):
        p["w" + name] = 0.05 * jax.random.normal(next(ki), (C, C, K2), jnp.float32)
        p["scale" + name], p["shift" + name] = bn(C)

    # geometry -> fc_in
    t = input_len + sum(PAD["conv_1"]) - first_k + 1
    t = (t + sum(PAD["pool_1"]) - 4) // 4 + 1
    for _ in range(3):
        t = t + sum(PAD["conv_2"]) - K2 + 1
    t_final = (t + sum(PAD["pool_2"]) - 3) // 3 + 1          # 2
    fc_in = C * t_final                                      # 256
    p["fc_w"] = 0.05 * jax.random.normal(next(ki), (n_classes, fc_in), jnp.float32)
    p["fc_b"] = 0.1 * jax.random.normal(next(ki), (n_classes,), jnp.float32)

    # ---- packed kernel slabs -------------------------------------------------
    # slab A (f32, rows padded to 24 x 128):
    #   [0, k1)        conv_1 weight, row = tap, lane = cout
    #   k1 / k1+1      conv_1 BN scale / shift
    #   k1+2 .. k1+4   conv_2..4 BN scale
    #   k1+5 .. k1+7   conv_2..4 BN shift
    #   k1+8           fc bias, zero-padded to 128 lanes
    w1_k = jnp.transpose(p["w1"], (2, 1, 0)).reshape(first_k, C)
    rows = [w1_k,
            p["scale1"][None, :], p["shift1"][None, :],
            p["scale2"][None, :], p["scale3"][None, :], p["scale4"][None, :],
            p["shift2"][None, :], p["shift3"][None, :], p["shift4"][None, :],
            jnp.pad(p["fc_b"], (0, C - n_classes))[None, :]]
    pA = jnp.concatenate(rows, axis=0)
    pad_rows = -(-pA.shape[0] // 8) * 8 - pA.shape[0]
    p["pA"] = jnp.pad(pA, ((0, pad_rows), (0, 0)))

    # slab B (bf16, (3*512 + 256, 128)):
    #   [li*512, (li+1)*512)  conv_{2+li} weight in im2col layout
    #                         (row = tap*128 + cin, lane = cout)
    #   [1536, 1792)          fc weight, time-major rows (t*128 + c), output
    #                         lanes zero-padded n_classes -> 128
    w234 = [jnp.transpose(p["w" + nm], (2, 1, 0)).reshape(KC, C)
            for nm in ("2", "3", "4")]
    fc_tm = jnp.transpose(p["fc_w"].reshape(n_classes, C, t_final),
                          (2, 1, 0)).reshape(t_final * C, n_classes)
    fc_pad = jnp.pad(fc_tm, ((0, 0), (0, C - n_classes)))
    p["pB"] = jnp.concatenate(w234 + [fc_pad], axis=0).astype(jnp.bfloat16)
    return p


if __name__ == "__main__":
    key = jax.random.PRNGKey(0)
    k_param, k_x = jax.random.split(key)
    params = make_params(k_param, fs=32, input_len=16, n_classes=3)

    # Input in PyTorch NCW layout: (batch=2, channels=1, length=16)
    x = jax.random.normal(k_x, (2, 1, 16), jnp.float32)

    fwd = jax.jit(tinysleepnet_forward)
    out = jax.block_until_ready(fwd(x, params))
    ref = jax.block_until_ready(ref_forward(x, params))

    assert out.shape == (2, 3), out.shape
    # Kernel uses bf16 MXU operands / bf16 conv_2..4 activations (f32
    # accumulate + f32 BN/LeakyReLU); reference is f32 HIGHEST -> loose tol
    # is intentional.
    np.testing.assert_allclose(np.asarray(out), np.asarray(ref),
                               rtol=5e-2, atol=3e-2)
    print("KERNEL_OK")
</pallas_src>

<mosaic_0001>
module attributes {stable_mosaic.version = 11 : i64} {
  func.func @kernel(%arg0: memref<2x24x128xf32, #tpu.memory_space<vmem>>, %arg1: memref<24x128xf32, #tpu.memory_space<vmem>>, %arg2: memref<1792x128xbf16, #tpu.memory_space<vmem>>, %arg3: memref<2x128xf32, #tpu.memory_space<vmem>>, %arg4: memref<16x128xbf16, #tpu.memory_space<vmem>>) attributes {dimension_semantics = [], scalar_prefetch = 0 : i64, scratch_operands = 1 : i64, tpu.core_type = #tpu.core_type<tc>} {
    %c0 = arith.constant 0 : index
    %c0_0 = arith.constant 0 : index
    %c0_1 = arith.constant 0 : index
    %0 = vector.load %arg0[%c0, %c0_0, %c0_1] : memref<2x24x128xf32, #tpu.memory_space<vmem>>, vector<2x16x128xf32>
    %c0_2 = arith.constant 0 : index
    %c0_3 = arith.constant 0 : index
    %1 = vector.load %arg1[%c0_2, %c0_3] : memref<24x128xf32, #tpu.memory_space<vmem>>, vector<1x128xf32>
    %2 = vector.shape_cast %1 : vector<1x128xf32> to vector<1x1x128xf32>
    %3 = vector.broadcast %2 : vector<1x1x128xf32> to vector<2x16x128xf32>
    %4 = arith.mulf %0, %3 : vector<2x16x128xf32>
    %c0_4 = arith.constant 0 : index
    %c1 = arith.constant 1 : index
    %c0_5 = arith.constant 0 : index
    %5 = vector.load %arg0[%c0_4, %c1, %c0_5] : memref<2x24x128xf32, #tpu.memory_space<vmem>>, vector<2x16x128xf32>
    %c1_6 = arith.constant 1 : index
    %c0_7 = arith.constant 0 : index
    %6 = vector.load %arg1[%c1_6, %c0_7] : memref<24x128xf32, #tpu.memory_space<vmem>>, vector<1x128xf32>
    %7 = vector.shape_cast %6 : vector<1x128xf32> to vector<1x1x128xf32>
    %8 = vector.broadcast %7 : vector<1x1x128xf32> to vector<2x16x128xf32>
    %9 = arith.mulf %5, %8 : vector<2x16x128xf32>
    %10 = arith.addf %4, %9 : vector<2x16x128xf32>
    %c0_8 = arith.constant 0 : index
    %c2 = arith.constant 2 : index
    %c0_9 = arith.constant 0 : index
    %11 = vector.load %arg0[%c0_8, %c2, %c0_9] : memref<2x24x128xf32, #tpu.memory_space<vmem>>, vector<2x16x128xf32>
    %c2_10 = arith.constant 2 : index
    %c0_11 = arith.constant 0 : index
    %12 = vector.load %arg1[%c2_10, %c0_11] : memref<24x128xf32, #tpu.memory_space<vmem>>, vector<1x128xf32>
    %13 = vector.shape_cast %12 : vector<1x128xf32> to vector<1x1x128xf32>
    %14 = vector.broadcast %13 : vector<1x1x128xf32> to vector<2x16x128xf32>
    %15 = arith.mulf %11, %14 : vector<2x16x128xf32>
    %16 = arith.addf %10, %15 : vector<2x16x128xf32>
    %c0_12 = arith.constant 0 : index
    %c3 = arith.constant 3 : index
    %c0_13 = arith.constant 0 : index
    %17 = vector.load %arg0[%c0_12, %c3, %c0_13] : memref<2x24x128xf32, #tpu.memory_space<vmem>>, vector<2x16x128xf32>
    %c3_14 = arith.constant 3 : index
    %c0_15 = arith.constant 0 : index
    %18 = vector.load %arg1[%c3_14, %c0_15] : memref<24x128xf32, #tpu.memory_space<vmem>>, vector<1x128xf32>
    %19 = vector.shape_cast %18 : vector<1x128xf32> to vector<1x1x128xf32>
    %20 = vector.broadcast %19 : vector<1x1x128xf32> to vector<2x16x128xf32>
    %21 = arith.mulf %17, %20 : vector<2x16x128xf32>
    %22 = arith.addf %16, %21 : vector<2x16x128xf32>
    %c0_16 = arith.constant 0 : index
    %c4 = arith.constant 4 : index
    %c0_17 = arith.constant 0 : index
    %23 = vector.load %arg0[%c0_16, %c4, %c0_17] : memref<2x24x128xf32, #tpu.memory_space<vmem>>, vector<2x16x128xf32>
    %c4_18 = arith.constant 4 : index
    %c0_19 = arith.constant 0 : index
    %24 = vector.load %arg1[%c4_18, %c0_19] : memref<24x128xf32, #tpu.memory_space<vmem>>, vector<1x128xf32>
    %25 = vector.shape_cast %24 : vector<1x128xf32> to vector<1x1x128xf32>
    %26 = vector.broadcast %25 : vector<1x1x128xf32> to vector<2x16x128xf32>
    %27 = arith.mulf %23, %26 : vector<2x16x128xf32>
    %28 = arith.addf %22, %27 : vector<2x16x128xf32>
    %c0_20 = arith.constant 0 : index
    %c5 = arith.constant 5 : index
    %c0_21 = arith.constant 0 : index
    %29 = vector.load %arg0[%c0_20, %c5, %c0_21] : memref<2x24x128xf32, #tpu.memory_space<vmem>>, vector<2x16x128xf32>
    %c5_22 = arith.constant 5 : index
    %c0_23 = arith.constant 0 : index
    %30 = vector.load %arg1[%c5_22, %c0_23] : memref<24x128xf32, #tpu.memory_space<vmem>>, vector<1x128xf32>
    %31 = vector.shape_cast %30 : vector<1x128xf32> to vector<1x1x128xf32>
    %32 = vector.broadcast %31 : vector<1x1x128xf32> to vector<2x16x128xf32>
    %33 = arith.mulf %29, %32 : vector<2x16x128xf32>
    %34 = arith.addf %28, %33 : vector<2x16x128xf32>
    %c0_24 = arith.constant 0 : index
    %c6 = arith.constant 6 : index
    %c0_25 = arith.constant 0 : index
    %35 = vector.load %arg0[%c0_24, %c6, %c0_25] : memref<2x24x128xf32, #tpu.memory_space<vmem>>, vector<2x16x128xf32>
    %c6_26 = arith.constant 6 : index
    %c0_27 = arith.constant 0 : index
    %36 = vector.load %arg1[%c6_26, %c0_27] : memref<24x128xf32, #tpu.memory_space<vmem>>, vector<1x128xf32>
    %37 = vector.shape_cast %36 : vector<1x128xf32> to vector<1x1x128xf32>
    %38 = vector.broadcast %37 : vector<1x1x128xf32> to vector<2x16x128xf32>
    %39 = arith.mulf %35, %38 : vector<2x16x128xf32>
    %40 = arith.addf %34, %39 : vector<2x16x128xf32>
    %c0_28 = arith.constant 0 : index
    %c7 = arith.constant 7 : index
    %c0_29 = arith.constant 0 : index
    %41 = vector.load %arg0[%c0_28, %c7, %c0_29] : memref<2x24x128xf32, #tpu.memory_space<vmem>>, vector<2x16x128xf32>
    %c7_30 = arith.constant 7 : index
    %c0_31 = arith.constant 0 : index
    %42 = vector.load %arg1[%c7_30, %c0_31] : memref<24x128xf32, #tpu.memory_space<vmem>>, vector<1x128xf32>
    %43 = vector.shape_cast %42 : vector<1x128xf32> to vector<1x1x128xf32>
    %44 = vector.broadcast %43 : vector<1x1x128xf32> to vector<2x16x128xf32>
    %45 = arith.mulf %41, %44 : vector<2x16x128xf32>
    %46 = arith.addf %40, %45 : vector<2x16x128xf32>
    %c8 = arith.constant 8 : index
    %c0_32 = arith.constant 0 : index
    %47 = vector.load %arg1[%c8, %c0_32] : memref<24x128xf32, #tpu.memory_space<vmem>>, vector<1x128xf32>
    %48 = vector.shape_cast %47 : vector<1x128xf32> to vector<1x1x128xf32>
    %49 = vector.broadcast %48 : vector<1x1x128xf32> to vector<2x16x128xf32>
    %50 = arith.mulf %46, %49 : vector<2x16x128xf32>
    %c9 = arith.constant 9 : index
    %c0_33 = arith.constant 0 : index
    %51 = vector.load %arg1[%c9, %c0_33] : memref<24x128xf32, #tpu.memory_space<vmem>>, vector<1x128xf32>
    %52 = vector.shape_cast %51 : vector<1x128xf32> to vector<1x1x128xf32>
    %53 = vector.broadcast %52 : vector<1x1x128xf32> to vector<2x16x128xf32>
    %54 = arith.addf %50, %53 : vector<2x16x128xf32>
    %cst = arith.constant 0.000000e+00 : f32
    %55 = vector.broadcast %cst : f32 to vector<2x16x128xf32>
    %56 = arith.cmpf oge, %54, %55 : vector<2x16x128xf32>
    %cst_34 = arith.constant 0.00999999977 : f32
    %57 = vector.broadcast %cst_34 : f32 to vector<2x16x128xf32>
    %58 = arith.mulf %57, %54 : vector<2x16x128xf32>
    %59 = arith.select %56, %54, %58 : vector<2x16x128xi1>, vector<2x16x128xf32>
    %cst_35 = arith.constant 0.000000e+00 : bf16
    %60 = vector.broadcast %cst_35 : bf16 to vector<16x128xbf16>
    %c0_36 = arith.constant 0 : index
    %c0_37 = arith.constant 0 : index
    %61 = vector.load %arg4[%c0_36, %c0_37] : memref<16x128xbf16, #tpu.memory_space<vmem>>, vector<16x128xbf16>
    tpu.vector_store %arg4[%c0_36, %c0_37], %60 {strides = array<i32>} : memref<16x128xbf16, #tpu.memory_space<vmem>>, vector<16x128xbf16>,
    %62 = vector.extract_strided_slice %59 {offsets = [0, 0, 0], sizes = [2, 1, 128], strides = [1, 1, 1]} : vector<2x16x128xf32> to vector<2x1x128xf32>
    %63 = vector.shape_cast %62 : vector<2x1x128xf32> to vector<2x128xf32>
    %64 = vector.extract_strided_slice %59 {offsets = [0, 1, 0], sizes = [2, 1, 128], strides = [1, 1, 1]} : vector<2x16x128xf32> to vector<2x1x128xf32>
    %65 = vector.shape_cast %64 : vector<2x1x128xf32> to vector<2x128xf32>
    %66 = arith.maximumf %63, %65 : vector<2x128xf32>
    %cst_38 = arith.constant 0.000000e+00 : f32
    %67 = vector.broadcast %cst_38 : f32 to vector<2x128xf32>
    %68 = arith.maximumf %66, %67 : vector<2x128xf32>
    %69 = arith.truncf %68 : vector<2x128xf32> to vector<2x128xbf16>
    %c2_39 = arith.constant 2 : index
    %c0_40 = arith.constant 0 : index
    %70 = vector.load %arg4[%c2_39, %c0_40] : memref<16x128xbf16, #tpu.memory_space<vmem>>, vector<2x128xbf16>
    tpu.vector_store %arg4[%c2_39, %c0_40], %69 {strides = array<i32>} : memref<16x128xbf16, #tpu.memory_space<vmem>>, vector<2x128xbf16>,
    %71 = vector.extract_strided_slice %59 {offsets = [0, 2, 0], sizes = [2, 1, 128], strides = [1, 1, 1]} : vector<2x16x128xf32> to vector<2x1x128xf32>
    %72 = vector.shape_cast %71 : vector<2x1x128xf32> to vector<2x128xf32>
    %73 = vector.extract_strided_slice %59 {offsets = [0, 3, 0], sizes = [2, 1, 128], strides = [1, 1, 1]} : vector<2x16x128xf32> to vector<2x1x128xf32>
    %74 = vector.shape_cast %73 : vector<2x1x128xf32> to vector<2x128xf32>
    %75 = arith.maximumf %72, %74 : vector<2x128xf32>
    %76 = vector.extract_strided_slice %59 {offsets = [0, 4, 0], sizes = [2, 1, 128], strides = [1, 1, 1]} : vector<2x16x128xf32> to vector<2x1x128xf32>
    %77 = vector.shape_cast %76 : vector<2x1x128xf32> to vector<2x128xf32>
    %78 = arith.maximumf %75, %77 : vector<2x128xf32>
    %79 = vector.extract_strided_slice %59 {offsets = [0, 5, 0], sizes = [2, 1, 128], strides = [1, 1, 1]} : vector<2x16x128xf32> to vector<2x1x128xf32>
    %80 = vector.shape_cast %79 : vector<2x1x128xf32> to vector<2x128xf32>
    %81 = arith.maximumf %78, %80 : vector<2x128xf32>
    %82 = arith.truncf %81 : vector<2x128xf32> to vector<2x128xbf16>
    %c4_41 = arith.constant 4 : index
    %c0_42 = arith.constant 0 : index
    %83 = vector.load %arg4[%c4_41, %c0_42] : memref<16x128xbf16, #tpu.memory_space<vmem>>, vector<2x128xbf16>
    tpu.vector_store %arg4[%c4_41, %c0_42], %82 {strides = array<i32>} : memref<16x128xbf16, #tpu.memory_space<vmem>>, vector<2x128xbf16>,
    %84 = vector.extract_strided_slice %59 {offsets = [0, 6, 0], sizes = [2, 1, 128], strides = [1, 1, 1]} : vector<2x16x128xf32> to vector<2x1x128xf32>
    %85 = vector.shape_cast %84 : vector<2x1x128xf32> to vector<2x128xf32>
    %86 = vector.extract_strided_slice %59 {offsets = [0, 7, 0], sizes = [2, 1, 128], strides = [1, 1, 1]} : vector<2x16x128xf32> to vector<2x1x128xf32>
    %87 = vector.shape_cast %86 : vector<2x1x128xf32> to vector<2x128xf32>
    %88 = arith.maximumf %85, %87 : vector<2x128xf32>
    %89 = vector.extract_strided_slice %59 {offsets = [0, 8, 0], sizes = [2, 1, 128], strides = [1, 1, 1]} : vector<2x16x128xf32> to vector<2x1x128xf32>
    %90 = vector.shape_cast %89 : vector<2x1x128xf32> to vector<2x128xf32>
    %91 = arith.maximumf %88, %90 : vector<2x128xf32>
    %92 = vector.extract_strided_slice %59 {offsets = [0, 9, 0], sizes = [2, 1, 128], strides = [1, 1, 1]} : vector<2x16x128xf32> to vector<2x1x128xf32>
    %93 = vector.shape_cast %92 : vector<2x1x128xf32> to vector<2x128xf32>
    %94 = arith.maximumf %91, %93 : vector<2x128xf32>
    %95 = arith.truncf %94 : vector<2x128xf32> to vector<2x128xbf16>
    %c6_43 = arith.constant 6 : index
    %c0_44 = arith.constant 0 : index
    %96 = vector.load %arg4[%c6_43, %c0_44] : memref<16x128xbf16, #tpu.memory_space<vmem>>, vector<2x128xbf16>
    tpu.vector_store %arg4[%c6_43, %c0_44], %95 {strides = array<i32>} : memref<16x128xbf16, #tpu.memory_space<vmem>>, vector<2x128xbf16>,
    %97 = vector.extract_strided_slice %59 {offsets = [0, 10, 0], sizes = [2, 1, 128], strides = [1, 1, 1]} : vector<2x16x128xf32> to vector<2x1x128xf32>
    %98 = vector.shape_cast %97 : vector<2x1x128xf32> to vector<2x128xf32>
    %99 = vector.extract_strided_slice %59 {offsets = [0, 11, 0], sizes = [2, 1, 128], strides = [1, 1, 1]} : vector<2x16x128xf32> to vector<2x1x128xf32>
    %100 = vector.shape_cast %99 : vector<2x1x128xf32> to vector<2x128xf32>
    %101 = arith.maximumf %98, %100 : vector<2x128xf32>
    %102 = vector.extract_strided_slice %59 {offsets = [0, 12, 0], sizes = [2, 1, 128], strides = [1, 1, 1]} : vector<2x16x128xf32> to vector<2x1x128xf32>
    %103 = vector.shape_cast %102 : vector<2x1x128xf32> to vector<2x128xf32>
    %104 = arith.maximumf %101, %103 : vector<2x128xf32>
    %105 = vector.extract_strided_slice %59 {offsets = [0, 13, 0], sizes = [2, 1, 128], strides = [1, 1, 1]} : vector<2x16x128xf32> to vector<2x1x128xf32>
    %106 = vector.shape_cast %105 : vector<2x1x128xf32> to vector<2x128xf32>
    %107 = arith.maximumf %104, %106 : vector<2x128xf32>
    %108 = arith.truncf %107 : vector<2x128xf32> to vector<2x128xbf16>
    %c8_45 = arith.constant 8 : index
    %c0_46 = arith.constant 0 : index
    %109 = vector.load %arg4[%c8_45, %c0_46] : memref<16x128xbf16, #tpu.memory_space<vmem>>, vector<2x128xbf16>
    tpu.vector_store %arg4[%c8_45, %c0_46], %108 {strides = array<i32>} : memref<16x128xbf16, #tpu.memory_space<vmem>>, vector<2x128xbf16>,
    %110 = vector.extract_strided_slice %59 {offsets = [0, 14, 0], sizes = [2, 1, 128], strides = [1, 1, 1]} : vector<2x16x128xf32> to vector<2x1x128xf32>
    %111 = vector.shape_cast %110 : vector<2x1x128xf32> to vector<2x128xf32>
    %112 = vector.extract_strided_slice %59 {offsets = [0, 15, 0], sizes = [2, 1, 128], strides = [1, 1, 1]} : vector<2x16x128xf32> to vector<2x1x128xf32>
    %113 = vector.shape_cast %112 : vector<2x1x128xf32> to vector<2x128xf32>
    %114 = arith.maximumf %111, %113 : vector<2x128xf32>
    %cst_47 = arith.constant 0.000000e+00 : f32
    %115 = vector.broadcast %cst_47 : f32 to vector<2x128xf32>
    %116 = arith.maximumf %114, %115 : vector<2x128xf32>
    %117 = arith.truncf %116 : vector<2x128xf32> to vector<2x128xbf16>
    %c10 = arith.constant 10 : index
    %c0_48 = arith.constant 0 : index
    %118 = vector.load %arg4[%c10, %c0_48] : memref<16x128xbf16, #tpu.memory_space<vmem>>, vector<2x128xbf16>
    tpu.vector_store %arg4[%c10, %c0_48], %117 {strides = array<i32>} : memref<16x128xbf16, #tpu.memory_space<vmem>>, vector<2x128xbf16>,
    %c0_49 = arith.constant 0 : index
    %c0_50 = arith.constant 0 : index
    %119 = vector.load %arg4[%c0_49, %c0_50] : memref<16x128xbf16, #tpu.memory_space<vmem>>, vector<10x128xbf16>
    %c2_51 = arith.constant 2 : index
    %c0_52 = arith.constant 0 : index
    %120 = vector.load %arg4[%c2_51, %c0_52] : memref<16x128xbf16, #tpu.memory_space<vmem>>, vector<10x128xbf16>
    %c4_53 = arith.constant 4 : index
    %c0_54 = arith.constant 0 : index
    %121 = vector.load %arg4[%c4_53, %c0_54] : memref<16x128xbf16, #tpu.memory_space<vmem>>, vector<10x128xbf16>
    %c6_55 = arith.constant 6 : index
    %c0_56 = arith.constant 0 : index
    %122 = vector.load %arg4[%c6_55, %c0_56] : memref<16x128xbf16, #tpu.memory_space<vmem>>, vector<10x128xbf16>
    %123 = tpu.concatenate %119, %120, %121, %122 in 1 : vector<10x128xbf16>, vector<10x128xbf16>, vector<10x128xbf16>, vector<10x128xbf16> -> vector<10x512xbf16>
    %c0_57 = arith.constant 0 : index
    %c0_58 = arith.constant 0 : index
    %124 = vector.load %arg2[%c0_57, %c0_58] : memref<1792x128xbf16, #tpu.memory_space<vmem>>, vector<512x128xbf16>
    %cst_59 = arith.constant dense<0.000000e+00> : vector<10x128xf32>
    %125 = tpu.matmul %123, %124, %cst_59 {dimension_numbers = #tpu.dot_dimension_numbers<[1], [0], [0], [1], [0, 0, 1, 1], [], []>} : vector<10x512xbf16>, vector<512x128xbf16>, vector<10x128xf32> -> vector<10x128xf32>
    %c10_60 = arith.constant 10 : index
    %c0_61 = arith.constant 0 : index
    %126 = vector.load %arg1[%c10_60, %c0_61] : memref<24x128xf32, #tpu.memory_space<vmem>>, vector<1x128xf32>
    %127 = vector.broadcast %126 : vector<1x128xf32> to vector<10x128xf32>
    %128 = arith.mulf %125, %127 : vector<10x128xf32>
    %c13 = arith.constant 13 : index
    %c0_62 = arith.constant 0 : index
    %129 = vector.load %arg1[%c13, %c0_62] : memref<24x128xf32, #tpu.memory_space<vmem>>, vector<1x128xf32>
    %130 = vector.broadcast %129 : vector<1x128xf32> to vector<10x128xf32>
    %131 = arith.addf %128, %130 : vector<10x128xf32>
    %cst_63 = arith.constant 0.000000e+00 : f32
    %132 = vector.broadcast %cst_63 : f32 to vector<10x128xf32>
    %133 = arith.cmpf oge, %131, %132 : vector<10x128xf32>
    %cst_64 = arith.constant 0.00999999977 : f32
    %134 = vector.broadcast %cst_64 : f32 to vector<10x128xf32>
    %135 = arith.mulf %134, %131 : vector<10x128xf32>
    %136 = arith.select %133, %131, %135 : vector<10x128xi1>, vector<10x128xf32>
    %137 = arith.truncf %136 : vector<10x128xf32> to vector<10x128xbf16>
    %c2_65 = arith.constant 2 : index
    %c0_66 = arith.constant 0 : index
    %138 = vector.load %arg4[%c2_65, %c0_66] : memref<16x128xbf16, #tpu.memory_space<vmem>>, vector<10x128xbf16>
    tpu.vector_store %arg4[%c2_65, %c0_66], %137 {strides = array<i32>} : memref<16x128xbf16, #tpu.memory_space<vmem>>, vector<10x128xbf16>,
    %c0_67 = arith.constant 0 : index
    %c0_68 = arith.constant 0 : index
    %139 = vector.load %arg4[%c0_67, %c0_68] : memref<16x128xbf16, #tpu.memory_space<vmem>>, vector<10x128xbf16>
    %c2_69 = arith.constant 2 : index
    %c0_70 = arith.constant 0 : index
    %140 = vector.load %arg4[%c2_69, %c0_70] : memref<16x128xbf16, #tpu.memory_space<vmem>>, vector<10x128xbf16>
    %c4_71 = arith.constant 4 : index
    %c0_72 = arith.constant 0 : index
    %141 = vector.load %arg4[%c4_71, %c0_72] : memref<16x128xbf16, #tpu.memory_space<vmem>>, vector<10x128xbf16>
    %c6_73 = arith.constant 6 : index
    %c0_74 = arith.constant 0 : index
    %142 = vector.load %arg4[%c6_73, %c0_74] : memref<16x128xbf16, #tpu.memory_space<vmem>>, vector<10x128xbf16>
    %143 = tpu.concatenate %139, %140, %141, %142 in 1 : vector<10x128xbf16>, vector<10x128xbf16>, vector<10x128xbf16>, vector<10x128xbf16> -> vector<10x512xbf16>
    %c512 = arith.constant 512 : index
    %c0_75 = arith.constant 0 : index
    %144 = vector.load %arg2[%c512, %c0_75] : memref<1792x128xbf16, #tpu.memory_space<vmem>>, vector<512x128xbf16>
    %cst_76 = arith.constant dense<0.000000e+00> : vector<10x128xf32>
    %145 = tpu.matmul %143, %144, %cst_76 {dimension_numbers = #tpu.dot_dimension_numbers<[1], [0], [0], [1], [0, 0, 1, 1], [], []>} : vector<10x512xbf16>, vector<512x128xbf16>, vector<10x128xf32> -> vector<10x128xf32>
    %c11 = arith.constant 11 : index
    %c0_77 = arith.constant 0 : index
    %146 = vector.load %arg1[%c11, %c0_77] : memref<24x128xf32, #tpu.memory_space<vmem>>, vector<1x128xf32>
    %147 = vector.broadcast %146 : vector<1x128xf32> to vector<10x128xf32>
    %148 = arith.mulf %145, %147 : vector<10x128xf32>
    %c14 = arith.constant 14 : index
    %c0_78 = arith.constant 0 : index
    %149 = vector.load %arg1[%c14, %c0_78] : memref<24x128xf32, #tpu.memory_space<vmem>>, vector<1x128xf32>
    %150 = vector.broadcast %149 : vector<1x128xf32> to vector<10x128xf32>
    %151 = arith.addf %148, %150 : vector<10x128xf32>
    %cst_79 = arith.constant 0.000000e+00 : f32
    %152 = vector.broadcast %cst_79 : f32 to vector<10x128xf32>
    %153 = arith.cmpf oge, %151, %152 : vector<10x128xf32>
    %cst_80 = arith.constant 0.00999999977 : f32
    %154 = vector.broadcast %cst_80 : f32 to vector<10x128xf32>
    %155 = arith.mulf %154, %151 : vector<10x128xf32>
    %156 = arith.select %153, %151, %155 : vector<10x128xi1>, vector<10x128xf32>
    %157 = arith.truncf %156 : vector<10x128xf32> to vector<10x128xbf16>
    %c2_81 = arith.constant 2 : index
    %c0_82 = arith.constant 0 : index
    %158 = vector.load %arg4[%c2_81, %c0_82] : memref<16x128xbf16, #tpu.memory_space<vmem>>, vector<10x128xbf16>
    tpu.vector_store %arg4[%c2_81, %c0_82], %157 {strides = array<i32>} : memref<16x128xbf16, #tpu.memory_space<vmem>>, vector<10x128xbf16>,
    %c0_83 = arith.constant 0 : index
    %c0_84 = arith.constant 0 : index
    %159 = vector.load %arg4[%c0_83, %c0_84] : memref<16x128xbf16, #tpu.memory_space<vmem>>, vector<10x128xbf16>
    %c2_85 = arith.constant 2 : index
    %c0_86 = arith.constant 0 : index
    %160 = vector.load %arg4[%c2_85, %c0_86] : memref<16x128xbf16, #tpu.memory_space<vmem>>, vector<10x128xbf16>
    %c4_87 = arith.constant 4 : index
    %c0_88 = arith.constant 0 : index
    %161 = vector.load %arg4[%c4_87, %c0_88] : memref<16x128xbf16, #tpu.memory_space<vmem>>, vector<10x128xbf16>
    %c6_89 = arith.constant 6 : index
    %c0_90 = arith.constant 0 : index
    %162 = vector.load %arg4[%c6_89, %c0_90] : memref<16x128xbf16, #tpu.memory_space<vmem>>, vector<10x128xbf16>
    %163 = tpu.concatenate %159, %160, %161, %162 in 1 : vector<10x128xbf16>, vector<10x128xbf16>, vector<10x128xbf16>, vector<10x128xbf16> -> vector<10x512xbf16>
    %c1024 = arith.constant 1024 : index
    %c0_91 = arith.constant 0 : index
    %164 = vector.load %arg2[%c1024, %c0_91] : memref<1792x128xbf16, #tpu.memory_space<vmem>>, vector<512x128xbf16>
    %cst_92 = arith.constant dense<0.000000e+00> : vector<10x128xf32>
    %165 = tpu.matmul %163, %164, %cst_92 {dimension_numbers = #tpu.dot_dimension_numbers<[1], [0], [0], [1], [0, 0, 1, 1], [], []>} : vector<10x512xbf16>, vector<512x128xbf16>, vector<10x128xf32> -> vector<10x128xf32>
    %c12 = arith.constant 12 : index
    %c0_93 = arith.constant 0 : index
    %166 = vector.load %arg1[%c12, %c0_93] : memref<24x128xf32, #tpu.memory_space<vmem>>, vector<1x128xf32>
    %167 = vector.broadcast %166 : vector<1x128xf32> to vector<10x128xf32>
    %168 = arith.mulf %165, %167 : vector<10x128xf32>
    %c15 = arith.constant 15 : index
    %c0_94 = arith.constant 0 : index
    %169 = vector.load %arg1[%c15, %c0_94] : memref<24x128xf32, #tpu.memory_space<vmem>>, vector<1x128xf32>
    %170 = vector.broadcast %169 : vector<1x128xf32> to vector<10x128xf32>
    %171 = arith.addf %168, %170 : vector<10x128xf32>
    %cst_95 = arith.constant 0.000000e+00 : f32
    %172 = vector.broadcast %cst_95 : f32 to vector<10x128xf32>
    %173 = arith.cmpf oge, %171, %172 : vector<10x128xf32>
    %cst_96 = arith.constant 0.00999999977 : f32
    %174 = vector.broadcast %cst_96 : f32 to vector<10x128xf32>
    %175 = arith.mulf %174, %171 : vector<10x128xf32>
    %176 = arith.select %173, %171, %175 : vector<10x128xi1>, vector<10x128xf32>
    %177 = vector.extract_strided_slice %176 {offsets = [0, 0], sizes = [2, 128], strides = [1, 1]} : vector<10x128xf32> to vector<2x128xf32>
    %178 = vector.extract_strided_slice %176 {offsets = [2, 0], sizes = [2, 128], strides = [1, 1]} : vector<10x128xf32> to vector<2x128xf32>
    %179 = arith.maximumf %177, %178 : vector<2x128xf32>
    %180 = vector.extract_strided_slice %176 {offsets = [4, 0], sizes = [2, 128], strides = [1, 1]} : vector<10x128xf32> to vector<2x128xf32>
    %181 = arith.maximumf %179, %180 : vector<2x128xf32>
    %182 = vector.extract_strided_slice %176 {offsets = [6, 0], sizes = [2, 128], strides = [1, 1]} : vector<10x128xf32> to vector<2x128xf32>
    %183 = vector.extract_strided_slice %176 {offsets = [8, 0], sizes = [2, 128], strides = [1, 1]} : vector<10x128xf32> to vector<2x128xf32>
    %184 = arith.maximumf %182, %183 : vector<2x128xf32>
    %cst_97 = arith.constant 0.000000e+00 : f32
    %185 = vector.broadcast %cst_97 : f32 to vector<2x128xf32>
    %186 = arith.maximumf %184, %185 : vector<2x128xf32>
    %187 = tpu.concatenate %181, %186 in 1 : vector<2x128xf32>, vector<2x128xf32> -> vector<2x256xf32>
    %188 = arith.truncf %187 : vector<2x256xf32> to vector<2x256xbf16>
    %c1536 = arith.constant 1536 : index
    %c0_98 = arith.constant 0 : index
    %189 = vector.load %arg2[%c1536, %c0_98] : memref<1792x128xbf16, #tpu.memory_space<vmem>>, vector<256x128xbf16>
    %cst_99 = arith.constant dense<0.000000e+00> : vector<2x128xf32>
    %190 = tpu.matmul %188, %189, %cst_99 {dimension_numbers = #tpu.dot_dimension_numbers<[1], [0], [0], [1], [0, 0, 1, 1], [], []>} : vector<2x256xbf16>, vector<256x128xbf16>, vector<2x128xf32> -> vector<2x128xf32>
    %c16 = arith.constant 16 : index
    %c0_100 = arith.constant 0 : index
    %191 = vector.load %arg1[%c16, %c0_100] : memref<24x128xf32, #tpu.memory_space<vmem>>, vector<1x128xf32>
    %192 = vector.broadcast %191 : vector<1x128xf32> to vector<2x128xf32>
    %193 = arith.addf %190, %192 : vector<2x128xf32>
    %c0_101 = arith.constant 0 : index
    %c0_102 = arith.constant 0 : index
    %194 = vector.load %arg3[%c0_101, %c0_102] : memref<2x128xf32, #tpu.memory_space<vmem>>, vector<2x128xf32>
    tpu.vector_store %arg3[%c0_101, %c0_102], %193 {strides = array<i32>} : memref<2x128xf32, #tpu.memory_space<vmem>>, vector<2x128xf32>,
    return
  }
}

</mosaic_0001>

<bundles_post_ra>
// kernel: tinysleepnet_forward.1
= control target key start
LH: loop header
LB: loop body
LE: loop exit
PB: predicated region body
PF: predicated region fallthrough
CT: control target
= control target key end

     0   :  { %8 = vsyncpa [#allocation4], 0  ;;  %s2281_s0 = inlined_call_operand.vmem [shape: f32[2,24,128], index: 0, kind: input, shape index: {}]   ;;  %s2282_s1 = inlined_call_operand.vmem [shape: f32[24,128], index: 1, kind: input, shape index: {}]   ;;  %s2283_s2 = inlined_call_operand.hbm [shape: bf16[1792,128], index: 2, kind: input, shape index: {}]   ;;  %s2284_s3 = inlined_call_operand.hbm [shape: f32[2,128], index: 3, kind: output, shape index: {}]  }
   0x1   :  { %9 = vsyncpa [#allocation5], 0  ;;  %s2081_s12 = smov [#allocation3]   ;;  %s2033_s16 = scalar_lea.hbm %s2283_s2, 14336 }
   0x2   :  { %s19_s13 = sshll.u32 %s2081_s12, 4  ;;  %p2034_p0 = scmp.ne.s32.totalorder %s2283_s2, %s2033_s16  ;;  %s20_s13 = int_to_ptr.vmem [resolvable:$true] %s19_s13 }
   0x3   :  { %p2037_p1 = scmp.lt.u32.totalorder %s2033_s16, %s2283_s2 }
   0x5   :  { %p2039_p2 = pnand %p2037_p1, %p2034_p0 }
   0x7   :  { %2042 = shalt.err (!%p2039_p2)
}
   0x8   :  { %s2043_s21 = scalar_lea.vmem %s20_s13, 14336  ;;  %p2048_p4 = scmp.lt.s32.totalorder %s20_s13, %s20_s13 }
   0x9   :  { %p2044_p3 = scmp.ne.s32.totalorder %s20_s13, %s2043_s21  ;;  %p2049_p5 = scmp.lt.s32.totalorder %s2043_s21, %s2043_s21 }
   0xb   :  { %p2050_p6 = por %p2049_p5, %p2048_p4 }
   0xd   :  { %p2051_p7 = pnand %p2050_p6, %p2044_p3 }
   0xf   :  { %2054 = shalt.err (!%p2051_p7)
}
  0x10   :  { %s2082_s22 = smov 64   ;;  %s2083_s23 = smov 4  }
  0x11   :  { %25 = dma.hbm_to_vmem [thread:$0]  %s2283_s2, 14336, %s20_s13, [#allocation4], %s2082_s22, %s2082_s22, %s2083_s23  }
  0x12   :  { %2077 = dma.done.wait [#allocation4], 14336  }
  0x13   :  { %2078 = vsyncadd [#allocation4], 4294952960  ;;  %v2084_v0 = vmov 0   ;;  %v1921_v1 = vld [vmem:[#allocation3 + $0x40] sm:$0xff]   ;;  %v1925_v5 = vld [vmem:[#allocation3 + $0x48] sm:$0xff]   ;;  %vm211_vm4 = vcmask 1043459  }
  0x14   :  { %192 = vst [vmem:[#allocation2] sm:$0xff] %v2084_v0  ;;  %v1922_v2 = vld [vmem:[#allocation3 + $0xc0] sm:$0xff]   ;;  %1762 = vmatprep.subr.bf16.mxu0 %v1921_v1  ;;  %v1926_v6 = vld [vmem:[#allocation3 + $0xc8] sm:$0xff]   ;;  %v1929_v9 = vld [vmem:[#allocation3 + $0x50] sm:$0xff]   ;;  %vm236_vm5 = vcmask 1045509   ;;  %vm262_vm6 = vcmask 1047559  }
  0x15   :  { %v1923_v3 = vld [vmem:[#allocation3] sm:$0xff]   ;;  %1784 = vmatprep.subr.bf16.mxu1 %v1922_v2  ;;  %v1927_v7 = vld [vmem:[#allocation3 + $0x8] sm:$0xff]   ;;  %v1930_v10 = vld [vmem:[#allocation3 + $0xd0] sm:$0xff]   ;;  %vm285_vm7 = vcmask 1041409   ;;  %s2085_s11 = smov [#allocation6]  }
  0x16   :  { %v1924_v4 = vld [vmem:[#allocation3 + $0x80] sm:$0xff]   ;;  %1763 = vmatpush3.bf16.msra.mxu0 %v1923_v3  ;;  %v1928_v8 = vld [vmem:[#allocation3 + $0x88] sm:$0xff]   ;;  %v1931_v11 = vld [vmem:[#allocation3 + $0x10] sm:$0xff]   ;;  %s1624_s12 = sshll.u32 %s2085_s11, 4  ;;  %s1625_s12 = int_to_ptr.vmem [resolvable:$true] %s1624_s12 }
  0x17   :  { %1785 = vmatpush3.bf16.msra.mxu1 %v1924_v4  ;;  %1764 = vmatprep.subr.bf16.mxu0 %v1925_v5  ;;  %v1932_v12 = vld [vmem:[#allocation3 + $0x90] sm:$0xff]   ;;  %v1933_v13 = vld [vmem:[#allocation3 + $0x58] sm:$0xff]   ;;  %v1937_v17 = vld [vmem:[#allocation3 + $0x60] sm:$0xff]   ;;  %s2055_s13 = scalar_lea.vmem %s1625_s12, 32  ;;  %p2060_p9 = scmp.lt.s32.totalorder %s1625_s12, %s1625_s12 }
  0x18   :  { %1786 = vmatprep.subr.bf16.mxu1 %v1926_v6  ;;  %v1934_v14 = vld [vmem:[#allocation3 + $0xd8] sm:$0xff]   ;;  %v1938_v18 = vld [vmem:[#allocation3 + $0xe0] sm:$0xff]   ;;  %v1941_v21 = vld [vmem:[#allocation3 + $0x68] sm:$0xff]   ;;  %p2056_p8 = scmp.ne.s32.totalorder %s1625_s12, %s2055_s13  ;;  %p2061_p10 = scmp.lt.s32.totalorder %s2055_s13, %s2055_s13 }
  0x19   :  { %v1935_v15 = vld [vmem:[#allocation3 + $0x18] sm:$0xff]   ;;  %v1939_v19 = vld [vmem:[#allocation3 + $0x20] sm:$0xff]   ;;  %v1942_v22 = vld [vmem:[#allocation3 + $0xe8] sm:$0xff]  }
  0x1a   :  { %1765 = vmatpush3.bf16.msra.mxu0 %v1927_v7  ;;  %v1936_v16 = vld [vmem:[#allocation3 + $0x98] sm:$0xff]   ;;  %v1940_v20 = vld [vmem:[#allocation3 + $0xa0] sm:$0xff]   ;;  %v1943_v23 = vld [vmem:[#allocation3 + $0x28] sm:$0xff]   ;;  %p2062_p11 = por %p2061_p10, %p2060_p9 }
  0x1b   :  { %1787 = vmatpush3.bf16.msra.mxu1 %v1928_v8  ;;  %1766 = vmatprep.subr.bf16.mxu0 %v1929_v9  ;;  %v1944_v24 = vld [vmem:[#allocation3 + $0xa8] sm:$0xff]   ;;  %v1945_v25 = vld [vmem:[#allocation3 + $0x70] sm:$0xff]   ;;  %v1949_v29 = vld [vmem:[#allocation3 + $0x78] sm:$0xff]  }
  0x1c   :  { %1788 = vmatprep.subr.bf16.mxu1 %v1930_v10  ;;  %v1946_v26 = vld [vmem:[#allocation3 + $0xf0] sm:$0xff]   ;;  %v1950_v30 = vld [vmem:[#allocation3 + $0xf8] sm:$0xff]   ;;  %v31_v34 = vld [vmem:[%s2281_s0 + $0x8] sm:$0xff]  ;;  %p2063_p12 = pnand %p2062_p11, %p2056_p8 }
  0x1d   :  { %v1947_v27 = vld [vmem:[#allocation3 + $0x30] sm:$0xff]   ;;  %v1951_v31 = vld [vmem:[#allocation3 + $0x38] sm:$0xff]   ;;  %v44_v43 = vld [vmem:[%s2281_s0 + $0x9] sm:$0xff] }
  0x1e   :  { %1767 = vmatpush3.bf16.msra.mxu0 %v1931_v11  ;;  %v1948_v28 = vld [vmem:[#allocation3 + $0xb0] sm:$0xff]   ;;  %v1952_v32 = vld [vmem:[#allocation3 + $0xb8] sm:$0xff]   ;;  %v61_v48 = vld [vmem:[%s2281_s0 + $0xa] sm:$0xff] }
  0x1f   :  { %1789 = vmatpush3.bf16.msra.mxu1 %v1932_v12  ;;  %1768 = vmatprep.subr.bf16.mxu0 %v1933_v13  ;;  %v30_v33 = vld [vmem:[%s2281_s0] sm:$0xff]  ;;  %v32_v35 = vld [vmem:[%s2281_s0 + $0x18] sm:$0xff]  ;;  %v78_v61 = vld [vmem:[%s2281_s0 + $0xb] sm:$0xff] }
  0x20   :  { %1790 = vmatprep.subr.bf16.mxu1 %v1934_v14  ;;  %v33_v36 = vld [vmem:[%s2281_s0 + $0x20] sm:$0xff]  ;;  %v95_v10 = vld [vmem:[%s2281_s0 + $0xc] sm:$0xff] }
  0x21   :  { %v1633_v37 = vld [vmem:[%s2282_s1] ss:$0 sm:$0xff]  ;;  %v43_v38 = vld [vmem:[%s2281_s0 + $0x1] sm:$0xff] }
  0x22   :  { %1769 = vmatpush3.bf16.msra.mxu0 %v1935_v15  ;;  %v39_v39 = vmul.f32 %v1633_v37, %v30_v33  ;;  %v40_v40 = vmul.f32 %v1633_v37, %v31_v34  ;;  %v41_v41 = vmul.f32 %v1633_v37, %v32_v35  ;;  %v42_v42 = vmul.f32 %v1633_v37, %v33_v36  ;;  %v45_v44 = vld [vmem:[%s2281_s0 + $0x19] sm:$0xff]  ;;  %v46_v45 = vld [vmem:[%s2281_s0 + $0x21] sm:$0xff] }
  0x23   :  { %1791 = vmatpush3.bf16.msra.mxu1 %v1936_v16  ;;  %1770 = vmatprep.subr.bf16.mxu0 %v1937_v17  ;;  %v1634_v46 = vld [vmem:[%s2282_s1 + $0x1] ss:$0 sm:$0xff]  ;;  %v60_v47 = vld [vmem:[%s2281_s0 + $0x2] sm:$0xff] }
  0x24   :  { %1792 = vmatprep.subr.bf16.mxu1 %v1938_v18  ;;  %v52_v49 = vmul.f32 %v1634_v46, %v43_v38  ;;  %v53_v50 = vmul.f32 %v1634_v46, %v44_v43  ;;  %v54_v51 = vmul.f32 %v1634_v46, %v45_v44  ;;  %v55_v52 = vmul.f32 %v1634_v46, %v46_v45  ;;  %v62_v53 = vld [vmem:[%s2281_s0 + $0x1a] sm:$0xff]  ;;  %v63_v54 = vld [vmem:[%s2281_s0 + $0x22] sm:$0xff]  ;;  %v146_v45 = vld [vmem:[%s2281_s0 + $0xf] sm:$0xff] }
  0x25   :  { %v1635_v55 = vld [vmem:[%s2282_s1 + $0x2] ss:$0 sm:$0xff]  ;;  %v77_v60 = vld [vmem:[%s2281_s0 + $0x3] sm:$0xff] }
  0x26   :  { %1771 = vmatpush3.bf16.msra.mxu0 %v1939_v19  ;;  %v69_v56 = vmul.f32 %v1635_v55, %v60_v47  ;;  %v70_v57 = vmul.f32 %v1635_v55, %v61_v48  ;;  %v71_v58 = vmul.f32 %v1635_v55, %v62_v53  ;;  %v72_v59 = vmul.f32 %v1635_v55, %v63_v54  ;;  %v79_v62 = vld [vmem:[%s2281_s0 + $0x1b] sm:$0xff]  ;;  %v80_v3 = vld [vmem:[%s2281_s0 + $0x23] sm:$0xff]  ;;  %v112_v19 = vld [vmem:[%s2281_s0 + $0xd] sm:$0xff] }
  0x27   :  { %1793 = vmatpush3.bf16.msra.mxu1 %v1940_v20  ;;  %1772 = vmatprep.subr.bf16.mxu0 %v1941_v21  ;;  %v56_v63 = vadd.f32 %v52_v49, %v39_v39  ;;  %v57_v0 = vadd.f32 %v53_v50, %v40_v40  ;;  %v58_v1 = vadd.f32 %v54_v51, %v41_v41  ;;  %v1636_v4 = vld [vmem:[%s2282_s1 + $0x3] ss:$0 sm:$0xff]  ;;  %v94_v5 = vld [vmem:[%s2281_s0 + $0x4] sm:$0xff] }
  0x28   :  { %1794 = vmatprep.subr.bf16.mxu1 %v1942_v22  ;;  %v59_v2 = vadd.f32 %v55_v52, %v42_v42  ;;  %v86_v6 = vmul.f32 %v1636_v4, %v77_v60  ;;  %v87_v7 = vmul.f32 %v1636_v4, %v78_v61  ;;  %v88_v8 = vmul.f32 %v1636_v4, %v79_v62  ;;  %v96_v11 = vld [vmem:[%s2281_s0 + $0x1c] sm:$0xff]  ;;  %v97_v12 = vld [vmem:[%s2281_s0 + $0x24] sm:$0xff] }
  0x29   :  { %v89_v9 = vmul.f32 %v1636_v4, %v80_v3  ;;  %v73_v13 = vadd.f32 %v69_v56, %v56_v63  ;;  %v74_v14 = vadd.f32 %v70_v57, %v57_v0  ;;  %v75_v15 = vadd.f32 %v71_v58, %v58_v1  ;;  %v1637_v17 = vld [vmem:[%s2282_s1 + $0x4] ss:$0 sm:$0xff]  ;;  %v111_v18 = vld [vmem:[%s2281_s0 + $0x5] sm:$0xff] }
  0x2a   :  { %1773 = vmatpush3.bf16.msra.mxu0 %v1943_v23  ;;  %v76_v16 = vadd.f32 %v72_v59, %v59_v2  ;;  %v103_v20 = vmul.f32 %v1637_v17, %v94_v5  ;;  %v104_v21 = vmul.f32 %v1637_v17, %v95_v10  ;;  %v105_v22 = vmul.f32 %v1637_v17, %v96_v11  ;;  %v130_v33 = vld [vmem:[%s2281_s0 + $0x1e] sm:$0xff]  ;;  %v131_v38 = vld [vmem:[%s2281_s0 + $0x26] sm:$0xff] }
  0x2b   :  { %1795 = vmatpush3.bf16.msra.mxu1 %v1944_v24  ;;  %1774 = vmatprep.subr.bf16.mxu0 %v1945_v25  ;;  %v106_v23 = vmul.f32 %v1637_v17, %v97_v12  ;;  %v113_v24 = vld [vmem:[%s2281_s0 + $0x1d] sm:$0xff]  ;;  %v114_v25 = vld [vmem:[%s2281_s0 + $0x25] sm:$0xff] }
  0x2c   :  { %1796 = vmatprep.subr.bf16.mxu1 %v1946_v26  ;;  %v1638_v26 = vld [vmem:[%s2282_s1 + $0x5] ss:$0 sm:$0xff]  ;;  %v1639_v39 = vld [vmem:[%s2282_s1 + $0x6] ss:$0 sm:$0xff]  ;;  %v145_v40 = vld [vmem:[%s2281_s0 + $0x7] sm:$0xff] }
  0x2d   :  { %v120_v34 = vmul.f32 %v1638_v26, %v111_v18  ;;  %v121_v35 = vmul.f32 %v1638_v26, %v112_v19  ;;  %v122_v36 = vmul.f32 %v1638_v26, %v113_v24  ;;  %v123_v37 = vmul.f32 %v1638_v26, %v114_v25  ;;  %v147_v46 = vld [vmem:[%s2281_s0 + $0x1f] sm:$0xff]  ;;  %v148_v47 = vld [vmem:[%s2281_s0 + $0x27] sm:$0xff] }
  0x2e   :  { %1775 = vmatpush3.bf16.msra.mxu0 %v1947_v27  ;;  %v90_v27 = vadd.f32 %v86_v6, %v73_v13  ;;  %v139_v50 = vmul.f32 %v1639_v39, %v130_v33  ;;  %v140_v51 = vmul.f32 %v1639_v39, %v131_v38  ;;  %v1640_v52 = vld [vmem:[%s2282_s1 + $0x7] ss:$0 sm:$0xff]  ;;  %v1953_v57 = vld [vmem:[#allocation3 + $0x140] sm:$0xff]  }
  0x2f   :  { %1797 = vmatpush3.bf16.msra.mxu1 %v1948_v28  ;;  %1776 = vmatprep.subr.bf16.mxu0 %v1949_v29  ;;  %v91_v28 = vadd.f32 %v87_v7, %v74_v14  ;;  %v92_v29 = vadd.f32 %v88_v8, %v75_v15  ;;  %v154_v58 = vmul.f32 %v1640_v52, %v145_v40  ;;  %v1954_v62 = vld [vmem:[#allocation3 + $0x1c0] sm:$0xff]  }
  0x30   :  { %1798 = vmatprep.subr.bf16.mxu1 %v1950_v30  ;;  %v93_v30 = vadd.f32 %v89_v9, %v76_v16  ;;  %v107_v41 = vadd.f32 %v103_v20, %v90_v27  ;;  %v155_v59 = vmul.f32 %v1640_v52, %v146_v45  ;;  %v156_v60 = vmul.f32 %v1640_v52, %v147_v46  ;;  %v1641_v3 = vld [vmem:[%s2282_s1 + $0x8] ss:$0 sm:$0xff]  ;;  %v1642_v4 = vld [vmem:[%s2282_s1 + $0x9] ss:$0 sm:$0xff] }
  0x31   :  { %v108_v42 = vadd.f32 %v104_v21, %v91_v28  ;;  %v109_v43 = vadd.f32 %v105_v22, %v92_v29  ;;  %v157_v61 = vmul.f32 %v1640_v52, %v148_v47 }
  0x32   :  { %1777 = vmatpush3.bf16.msra.mxu0 %v1951_v31  ;;  %v128_v31 = vld [vmem:[%s2281_s0 + $0x6] sm:$0xff]  ;;  %v110_v44 = vadd.f32 %v106_v23, %v93_v30  ;;  %v124_v53 = vadd.f32 %v120_v34, %v107_v41 }
  0x33   :  { %1799 = vmatpush3.bf16.msra.mxu1 %v1952_v32  ;;  %v129_v32 = vld [vmem:[%s2281_s0 + $0xe] sm:$0xff]  ;;  %v137_v48 = vmul.f32 %v1639_v39, %v128_v31  ;;  %v125_v54 = vadd.f32 %v121_v35, %v108_v42  ;;  %v126_v55 = vadd.f32 %v122_v36, %v109_v43  ;;  %1806 = vmatprep.subr.bf16.mxu0 %v1953_v57 }
  0x34   :  { %v138_v49 = vmul.f32 %v1639_v39, %v129_v32  ;;  %v127_v56 = vadd.f32 %v123_v37, %v110_v44  ;;  %1828 = vmatprep.subr.bf16.mxu1 %v1954_v62 }
  0x35   :  { %v141_v63 = vadd.f32 %v137_v48, %v124_v53  ;;  %v143_v1 = vadd.f32 %v139_v50, %v126_v55 }
  0x36   :  { %v142_v0 = vadd.f32 %v138_v49, %v125_v54  ;;  %v144_v2 = vadd.f32 %v140_v51, %v127_v56 }
  0x37   :  { %v158_v5 = vadd.f32 %v154_v58, %v141_v63  ;;  %v160_v7 = vadd.f32 %v156_v60, %v143_v1 }
  0x38   :  { %v159_v6 = vadd.f32 %v155_v59, %v142_v0  ;;  %v161_v8 = vadd.f32 %v157_v61, %v144_v2 }
  0x39   :  { %v167_v9 = vmul.f32 %v1641_v3, %v158_v5  ;;  %v169_v11 = vmul.f32 %v1641_v3, %v160_v7 }
  0x3a   :  { %v168_v10 = vmul.f32 %v1641_v3, %v159_v6  ;;  %v170_v12 = vmul.f32 %v1641_v3, %v161_v8 }
  0x3b   :  { %v176_v13 = vadd.f32 %v1642_v4, %v167_v9  ;;  %v178_v15 = vadd.f32 %v1642_v4, %v169_v11 }
  0x3c   :  { %v177_v14 = vadd.f32 %v1642_v4, %v168_v10  ;;  %v179_v16 = vadd.f32 %v1642_v4, %v170_v12 }
  0x3d   :  { %vm180_vm0 = vcmp.ge.f32.partialorder %v176_v13, 0.0  ;;  %vm182_vm2 = vcmp.ge.f32.partialorder %v178_v15, 0.0  ;;  %v184_v17 = vmul.f32 0.01, %v176_v13  ;;  %v186_v19 = vmul.f32 0.01, %v178_v15 }
  0x3e   :  { %vm181_vm1 = vcmp.ge.f32.partialorder %v177_v14, 0.0  ;;  %vm183_vm3 = vcmp.ge.f32.partialorder %v179_v16, 0.0  ;;  %v185_v18 = vmul.f32 0.01, %v177_v14  ;;  %v187_v20 = vmul.f32 0.01, %v179_v16 }
  0x3f   :  { %v188_v21 = vsel %vm180_vm0, %v176_v13, %v184_v17  ;;  %v190_v23 = vsel %vm182_vm2, %v178_v15, %v186_v19 }
  0x40   :  { %v189_v22 = vsel %vm181_vm1, %v177_v14, %v185_v18  ;;  %v191_v24 = vsel %vm183_vm3, %v179_v16, %v187_v20  ;;  %v195_v25 = vrot.slane %v188_v21, 1  ;;  %v196_v26 = vrot.slane %v190_v23, 1 }
  0x41   :  { %v216_v27 = vrot.slane %v188_v21, 2  ;;  %v217_v28 = vrot.slane %v190_v23, 2  ;;  %v222_v29 = vrot.slane %v188_v21, 3  ;;  %v223_v30 = vrot.slane %v190_v23, 3 }
  0x42   :  { %v199_v31 = vmax.f32 %v188_v21, %v195_v25  ;;  %v200_v32 = vmax.f32 %v190_v23, %v196_v26  ;;  %v243_v33 = vrot.slane %v189_v22, 2  ;;  %v244_v34 = vrot.slane %v191_v24, 2 }
  0x43   :  { %v249_v35 = vrot.slane %v189_v22, 3  ;;  %v250_v36 = vrot.slane %v191_v24, 3  ;;  %v267_v37 = vrot.slane %v189_v22, 1  ;;  %v268_v38 = vrot.slane %v191_v24, 1 }
  0x44   :  { %v201_v39 = vmax.f32 %v199_v31, 0.0  ;;  %v202_v40 = vmax.f32 %v200_v32, 0.0  ;;  %v220_v41 = vmax.f32 %v199_v31, %v216_v27  ;;  %v221_v42 = vmax.f32 %v200_v32, %v217_v28 }
  0x45   :  { %v247_v43 = vmax.f32 %v199_v31, %v243_v33  ;;  %v248_v44 = vmax.f32 %v200_v32, %v244_v34  ;;  %v271_v45 = vmax.f32 %v189_v22, %v267_v37  ;;  %v272_v46 = vmax.f32 %v191_v24, %v268_v38 }
  0x46   :  { %v203_v47 = vpack.c.bf16 %v201_v39, %v201_v39  ;;  %v204_v48 = vpack.c.bf16 %v202_v40, %v202_v40  ;;  %v226_v49 = vmax.f32 %v220_v41, %v222_v29  ;;  %v227_v50 = vmax.f32 %v221_v42, %v223_v30  ;;  %v1956_v40 = vld [vmem:[#allocation3 + $0x180] sm:$0xff]   ;;  %v1957_v41 = vld [vmem:[#allocation3 + $0x148] sm:$0xff]  }
  0x47   :  { %v253_v51 = vmax.f32 %v247_v43, %v249_v35  ;;  %v254_v52 = vmax.f32 %v248_v44, %v250_v36  ;;  %v273_v53 = vmax.f32 %v271_v45, %v243_v33  ;;  %v274_v54 = vmax.f32 %v272_v46, %v244_v34  ;;  %v1955_v33 = vld [vmem:[#allocation3 + $0x100] sm:$0xff]   ;;  %v1958_v42 = vld [vmem:[#allocation3 + $0x1c8] sm:$0xff]  }
  0x48   :  { %v207_v55 = vunpack.c.l.b16 %v203_v47  ;;  %v208_v56 = vunpack.c.l.b16 %v204_v48  ;;  %v228_v57 = vpack.c.bf16 %v226_v49, %v226_v49  ;;  %v229_v58 = vpack.c.bf16 %v227_v50, %v227_v50  ;;  %v1959_v43 = vld [vmem:[#allocation3 + $0x108] sm:$0xff]   ;;  %v1963_v47 = vld [vmem:[#allocation3 + $0x110] sm:$0xff]   ;;  %v1965_v49 = vld [vmem:[#allocation3 + $0x158] sm:$0xff]  }
  0x49   :  { %v255_v59 = vpack.c.bf16 %v253_v51, %v253_v51  ;;  %v256_v60 = vpack.c.bf16 %v254_v52, %v254_v52  ;;  %v275_v61 = vmax.f32 %v273_v53, %v249_v35  ;;  %v276_v62 = vmax.f32 %v274_v54, %v250_v36  ;;  %v1960_v44 = vld [vmem:[#allocation3 + $0x188] sm:$0xff]   ;;  %v1964_v48 = vld [vmem:[#allocation3 + $0x190] sm:$0xff]   ;;  %v1966_v50 = vld [vmem:[#allocation3 + $0x1d8] sm:$0xff]  }
  0x4a   :  { %v209_v63 = vrot.slane %v207_v55, 6  ;;  %v210_v0 = vrot.slane %v208_v56, 5  ;;  %v232_v1 = vunpack.c.l.b16 %v228_v57  ;;  %v233_v2 = vunpack.c.l.b16 %v229_v58  ;;  %v1967_v51 = vld [vmem:[#allocation3 + $0x118] sm:$0xff]   ;;  %v1969_v53 = vld [vmem:[#allocation3 + $0x160] sm:$0xff]   ;;  %v1973_v57 = vld [vmem:[#allocation3 + $0x168] sm:$0xff]  }
  0x4b   :  { %v259_v3 = vunpack.c.l.b16 %v255_v59  ;;  %v260_v4 = vunpack.c.l.b16 %v256_v60  ;;  %v277_v5 = vpack.c.bf16 %v275_v61, %v275_v61  ;;  %v278_v6 = vpack.c.bf16 %v276_v62, %v276_v62  ;;  %v1968_v52 = vld [vmem:[#allocation3 + $0x198] sm:$0xff]   ;;  %v1970_v54 = vld [vmem:[#allocation3 + $0x1e0] sm:$0xff]   ;;  %v1974_v58 = vld [vmem:[#allocation3 + $0x1e8] sm:$0xff]  }
  0x4c   :  { %v212_v7 = vsel %vm211_vm4, %v210_v0, %v209_v63  ;;  %v234_v8 = vrot.slane %v232_v1, 6  ;;  %v235_v9 = vrot.slane %v233_v2, 5  ;;  %v290_v10 = vmax.f32 %v271_v45, 0.0  ;;  %v1961_v45 = vld [vmem:[#allocation3 + $0x150] sm:$0xff]   ;;  %v1971_v55 = vld [vmem:[#allocation3 + $0x120] sm:$0xff]   ;;  %v1975_v59 = vld [vmem:[#allocation3 + $0x128] sm:$0xff]  }
  0x4d   :  { %v213_v11 = vpack.c.b16 %v212_v7, %v212_v7  ;;  %v261_v12 = vrot.slane %v260_v4, 7  ;;  %v281_v13 = vunpack.c.l.b16 %v277_v5  ;;  %v282_v14 = vunpack.c.l.b16 %v278_v6  ;;  %v1972_v56 = vld [vmem:[#allocation3 + $0x1a0] sm:$0xff]   ;;  %v1976_v60 = vld [vmem:[#allocation3 + $0x1a8] sm:$0xff]   ;;  %v1977_v61 = vld [vmem:[#allocation3 + $0x170] sm:$0xff]  }
  0x4e   :  { %v237_v15 = vsel %vm236_vm5, %v235_v9, %v234_v8  ;;  %v291_v16 = vmax.f32 %v272_v46, 0.0  ;;  %v292_v17 = vpack.c.bf16 %v290_v10, %v290_v10  ;;  %v1962_v46 = vld [vmem:[#allocation3 + $0x1d0] sm:$0xff]   ;;  %v1981_v1 = vld [vmem:[#allocation3 + $0x178] sm:$0xff]   ;;  %v1985_v5 = vld [vmem:[#allocation3 + $0x240] sm:$0xff]  }
  0x4f   :  { %215 = vst [vmem:[#allocation2] sm:$0x2] %v213_v11  ;;  %v238_v18 = vpack.c.b16 %v237_v15, %v237_v15  ;;  %v263_v19 = vsel %vm262_vm6, %v261_v12, %v259_v3  ;;  %v283_v20 = vrot.slane %v281_v13, 2  ;;  %v284_v21 = vrot.slane %v282_v14, 1  ;;  %v1978_v62 = vld [vmem:[#allocation3 + $0x1f0] sm:$0xff]   ;;  %v1982_v2 = vld [vmem:[#allocation3 + $0x1f8] sm:$0xff]  }
  0x50   :  { %v264_v22 = vpack.c.b16 %v263_v19, %v263_v19  ;;  %v293_v23 = vpack.c.bf16 %v291_v16, %v291_v16  ;;  %v296_v24 = vunpack.c.l.b16 %v292_v17  ;;  %v1979_v63 = vld [vmem:[#allocation3 + $0x130] sm:$0xff]   ;;  %v1983_v3 = vld [vmem:[#allocation3 + $0x138] sm:$0xff]   ;;  %v1986_v6 = vld [vmem:[#allocation3 + $0x2c0] sm:$0xff]  }
  0x51   :  { %240 = vst [vmem:[#allocation2] sm:$0x4] %v238_v18  ;;  %v286_v25 = vsel %vm285_vm7, %v284_v21, %v283_v20  ;;  %v1980_v0 = vld [vmem:[#allocation3 + $0x1b0] sm:$0xff]   ;;  %v1984_v4 = vld [vmem:[#allocation3 + $0x1b8] sm:$0xff]   ;;  %v1675_v15 = vld [vmem:[%s2282_s1 + $0xa] ss:$0 sm:$0xff] }
  0x52   :  { %266 = vst [vmem:[#allocation2] sm:$0x8] %v264_v22  ;;  %v287_v26 = vpack.c.b16 %v286_v25, %v286_v25  ;;  %v297_v27 = vunpack.c.l.b16 %v293_v23  ;;  %v298_v28 = vrot.slane %v296_v24, 4  ;;  %v1676_v21 = vld [vmem:[%s2282_s1 + $0xd] ss:$0 sm:$0xff] }
  0x54   :  { %289 = vst [vmem:[#allocation2] sm:$0x10] %v287_v26  ;;  %v299_v29 = vrot.slane %v297_v27, 3 }
  0x56   :  { %v300_v30 = vsel %vm211_vm4, %v299_v29, %v298_v28 }
  0x57   :  { %v301_v31 = vpack.c.b16 %v300_v30, %v300_v30 }
  0x59   :  { %303 = vst [vmem:[#allocation2] sm:$0x20] %v301_v31 }
  0x5b   :  { %v304_v32 = vld [vmem:[#allocation2] sm:$0x1f] }
  0x60   :  { %v305_v34 = vld [vmem:[#allocation2] sm:$0x3e] }
  0x61   :  { %v307_v35 = vld [vmem:[#allocation2] sm:$0xf8]  ;;  %v309_v37 = vrot.slane %v305_v34, 1 }
  0x62   :  { %v306_v36 = vld [vmem:[#allocation2] sm:$0x7c]  ;;  %v315_v38 = vrot.slane %v307_v35, 3 }
  0x63   :  { %v312_v39 = vrot.slane %v306_v36, 2  ;;  %605 = vmatprep.mubr.bf16.mxu0 %v309_v37 }
  0x64   :  { %646 = vmatprep.mubr.bf16.mxu1 %v315_v38  ;;  %606 = vmatmul.mubr.bf16.vlgmr.msra.gmra.mrb[0].mxu0 %v304_v32  ;;  %v1987_v38 = vld [vmem:[#allocation3 + $0x200] sm:$0xff]  }
  0x65   :  { %647 = vmatmul.mubr.bf16.vlgmr.msra.gmra.mrb[0].mxu1 %v312_v39  ;;  %1807 = vmatpush3.bf16.msra.mxu0 %v1955_v33  ;;  %v1988_v39 = vld [vmem:[#allocation3 + $0x280] sm:$0xff]  }
  0x66   :  { %1829 = vmatpush3.bf16.msra.mxu1 %v1956_v40  ;;  %1808 = vmatprep.subr.bf16.mxu0 %v1957_v41 }
  0x67   :  { %1830 = vmatprep.subr.bf16.mxu1 %v1958_v42  ;;  %v1989_v42 = vld [vmem:[#allocation3 + $0x248] sm:$0xff]  }
  0x69   :  { %1809 = vmatpush3.bf16.msra.mxu0 %v1959_v43  ;;  %v1990_v43 = vld [vmem:[#allocation3 + $0x2c8] sm:$0xff]  }
  0x6a   :  { %1831 = vmatpush3.bf16.msra.mxu1 %v1960_v44  ;;  %1810 = vmatprep.subr.bf16.mxu0 %v1961_v45  ;;  %v1991_v44 = vld [vmem:[#allocation3 + $0x208] sm:$0xff]  }
  0x6b   :  { %1832 = vmatprep.subr.bf16.mxu1 %v1962_v46  ;;  %v1992_v45 = vld [vmem:[#allocation3 + $0x288] sm:$0xff]   ;;  %v1993_v46 = vld [vmem:[#allocation3 + $0x250] sm:$0xff]  }
  0x6d   :  { %1811 = vmatpush3.bf16.msra.mxu0 %v1963_v47  ;;  %v1994_v47 = vld [vmem:[#allocation3 + $0x2d0] sm:$0xff]  }
  0x6e   :  { %1833 = vmatpush3.bf16.msra.mxu1 %v1964_v48  ;;  %1812 = vmatprep.subr.bf16.mxu0 %v1965_v49  ;;  %v1995_v48 = vld [vmem:[#allocation3 + $0x210] sm:$0xff]  }
  0x6f   :  { %1834 = vmatprep.subr.bf16.mxu1 %v1966_v50  ;;  %v1996_v49 = vld [vmem:[#allocation3 + $0x290] sm:$0xff]   ;;  %v1997_v50 = vld [vmem:[#allocation3 + $0x258] sm:$0xff]  }
  0x71   :  { %1813 = vmatpush3.bf16.msra.mxu0 %v1967_v51  ;;  %v1998_v51 = vld [vmem:[#allocation3 + $0x2d8] sm:$0xff]  }
  0x72   :  { %1835 = vmatpush3.bf16.msra.mxu1 %v1968_v52  ;;  %1814 = vmatprep.subr.bf16.mxu0 %v1969_v53  ;;  %v1999_v52 = vld [vmem:[#allocation3 + $0x218] sm:$0xff]  }
  0x73   :  { %1836 = vmatprep.subr.bf16.mxu1 %v1970_v54  ;;  %v2000_v53 = vld [vmem:[#allocation3 + $0x298] sm:$0xff]   ;;  %v2001_v54 = vld [vmem:[#allocation3 + $0x260] sm:$0xff]  }
  0x75   :  { %1815 = vmatpush3.bf16.msra.mxu0 %v1971_v55  ;;  %v2002_v55 = vld [vmem:[#allocation3 + $0x2e0] sm:$0xff]  }
  0x76   :  { %1837 = vmatpush3.bf16.msra.mxu1 %v1972_v56  ;;  %1816 = vmatprep.subr.bf16.mxu0 %v1973_v57  ;;  %v2003_v56 = vld [vmem:[#allocation3 + $0x220] sm:$0xff]  }
  0x77   :  { %1838 = vmatprep.subr.bf16.mxu1 %v1974_v58  ;;  %v2004_v57 = vld [vmem:[#allocation3 + $0x2a0] sm:$0xff]   ;;  %v2005_v58 = vld [vmem:[#allocation3 + $0x268] sm:$0xff]  }
  0x79   :  { %1817 = vmatpush3.bf16.msra.mxu0 %v1975_v59  ;;  %v2006_v59 = vld [vmem:[#allocation3 + $0x2e8] sm:$0xff]  }
  0x7a   :  { %1839 = vmatpush3.bf16.msra.mxu1 %v1976_v60  ;;  %1818 = vmatprep.subr.bf16.mxu0 %v1977_v61  ;;  %v2007_v60 = vld [vmem:[#allocation3 + $0x228] sm:$0xff]  }
  0x7b   :  { %1840 = vmatprep.subr.bf16.mxu1 %v1978_v62  ;;  %v2008_v61 = vld [vmem:[#allocation3 + $0x2a8] sm:$0xff]   ;;  %v2009_v62 = vld [vmem:[#allocation3 + $0x270] sm:$0xff]  }
  0x7d   :  { %1819 = vmatpush3.bf16.msra.mxu0 %v1979_v63  ;;  %v2010_v63 = vld [vmem:[#allocation3 + $0x2f0] sm:$0xff]  }
  0x7e   :  { %1841 = vmatpush3.bf16.msra.mxu1 %v1980_v0  ;;  %1820 = vmatprep.subr.bf16.mxu0 %v1981_v1  ;;  %v2011_v0 = vld [vmem:[#allocation3 + $0x230] sm:$0xff]  }
  0x7f   :  { %1842 = vmatprep.subr.bf16.mxu1 %v1982_v2  ;;  %v2012_v1 = vld [vmem:[#allocation3 + $0x2b0] sm:$0xff]   ;;  %v2013_v2 = vld [vmem:[#allocation3 + $0x278] sm:$0xff]  }
  0x81   :  { %1821 = vmatpush3.bf16.msra.mxu0 %v1983_v3  ;;  %v2014_v3 = vld [vmem:[#allocation3 + $0x2f8] sm:$0xff]  }
  0x82   :  { %1843 = vmatpush3.bf16.msra.mxu1 %v1984_v4  ;;  %1850 = vmatprep.subr.bf16.mxu0 %v1985_v5  ;;  %v2015_v4 = vld [vmem:[#allocation3 + $0x238] sm:$0xff]  }
  0x83   :  { %1872 = vmatprep.subr.bf16.mxu1 %v1986_v6  ;;  %v2016_v5 = vld [vmem:[#allocation3 + $0x2b8] sm:$0xff]   ;;  %v2017_v6 = vld [vmem:[#allocation3 + $0x340] sm:$0xff]  }
 0x137   :  { %v1778_v7 = vpop.f32.mrb[0].mxu0 }
 0x138   :  { %v1800_v8 = vpop.f32.mrb[0].mxu1  ;;  %v1779_v9 = vpop.f32.mrb[1].mxu0 }
 0x139   :  { %v1801_v10 = vpop.f32.mrb[1].mxu1  ;;  %v1780_v11 = vadd.f32 %v1779_v9, %v1778_v7  ;;  %v1781_v13 = vpop.f32.mrb[2].mxu0 }
 0x13a   :  { %v1802_v12 = vadd.f32 %v1801_v10, %v1800_v8  ;;  %v1803_v14 = vpop.f32.mrb[2].mxu1  ;;  %v1782_v16 = vpop.f32.mrb[3].mxu0 }
 0x13b   :  { %v1804_v17 = vpop.f32.mrb[3].mxu1  ;;  %v1783_v19 = vadd.f32 %v1782_v16, %v1781_v13 }
 0x13c   :  { %v649_v18 = vadd.f32 %v1802_v12, %v1780_v11  ;;  %v1805_v20 = vadd.f32 %v1804_v17, %v1803_v14 }
 0x13e   :  { %v660_v22 = vmul.f32 %v1675_v15, %v649_v18  ;;  %v652_v23 = vadd.f32 %v1805_v20, %v1783_v19 }
 0x140   :  { %v667_v24 = vadd.f32 %v1676_v21, %v660_v22  ;;  %v661_v25 = vmul.f32 %v1675_v15, %v652_v23  ;;  %v1709_v15 = vld [vmem:[%s2282_s1 + $0xb] ss:$0 sm:$0xff] }
 0x142   :  { %v671_v26 = vmul.f32 0.01, %v667_v24  ;;  %v668_v27 = vadd.f32 %v1676_v21, %v661_v25  ;;  %vm669_vm8 = vcmp.ge.f32.partialorder %v667_v24, 0.0  ;;  %v1710_v21 = vld [vmem:[%s2282_s1 + $0xe] ss:$0 sm:$0xff] }
 0x144   :  { %vm670_vm9 = vcmp.ge.f32.partialorder %v668_v27, 0.0  ;;  %v672_v28 = vmul.f32 0.01, %v668_v27  ;;  %v673_v29 = vsel %vm669_vm8, %v667_v24, %v671_v26 }
 0x146   :  { %v674_v30 = vsel %vm670_vm9, %v668_v27, %v672_v28 }
 0x147   :  { %v675_v31 = vpack.c.bf16 %v674_v30, %v673_v29 }
 0x149   :  { %v677_v32 = vrot.slane %v675_v31, 7 }
 0x14b   :  { %679 = vst [vmem:[#allocation2] sm:$0x3e] %v677_v32 }
 0x152   :  { %v681_v33 = vld [vmem:[#allocation2] sm:$0x3e] }
 0x153   :  { %v683_v34 = vld [vmem:[#allocation2] sm:$0xf8]  ;;  %v685_v35 = vrot.slane %v681_v33, 1 }
 0x154   :  { %v691_v36 = vrot.slane %v683_v34, 3  ;;  %v682_v37 = vld [vmem:[#allocation2] sm:$0x7c] }
 0x155   :  { %v688_v40 = vrot.slane %v682_v37, 2  ;;  %981 = vmatprep.mubr.bf16.mxu0 %v685_v35  ;;  %v680_v41 = vld [vmem:[#allocation2] sm:$0x1f] }
 0x156   :  { %1022 = vmatprep.mubr.bf16.mxu1 %v691_v36  ;;  %982 = vmatmul.mubr.bf16.vlgmr.msra.gmra.mrb[4].mxu0 %v680_v41 }
 0x157   :  { %1023 = vmatmul.mubr.bf16.vlgmr.msra.gmra.mrb[4].mxu1 %v688_v40  ;;  %1851 = vmatpush3.bf16.msra.mxu0 %v1987_v38  ;;  %v2018_v38 = vld [vmem:[#allocation3 + $0x300] sm:$0xff]   ;;  %v2019_v40 = vld [vmem:[#allocation3 + $0x348] sm:$0xff]  }
 0x158   :  { %1873 = vmatpush3.bf16.msra.mxu1 %v1988_v39  ;;  %1852 = vmatprep.subr.bf16.mxu0 %v1989_v42  ;;  %v2020_v42 = vld [vmem:[#allocation3 + $0x308] sm:$0xff]  }
 0x159   :  { %1874 = vmatprep.subr.bf16.mxu1 %v1990_v43  ;;  %v2021_v43 = vld [vmem:[#allocation3 + $0x350] sm:$0xff]  }
 0x15b   :  { %1853 = vmatpush3.bf16.msra.mxu0 %v1991_v44  ;;  %v2022_v44 = vld [vmem:[#allocation3 + $0x310] sm:$0xff]  }
 0x15c   :  { %1875 = vmatpush3.bf16.msra.mxu1 %v1992_v45  ;;  %1854 = vmatprep.subr.bf16.mxu0 %v1993_v46  ;;  %v2023_v45 = vld [vmem:[#allocation3 + $0x358] sm:$0xff]  }
 0x15d   :  { %1876 = vmatprep.subr.bf16.mxu1 %v1994_v47  ;;  %v2024_v46 = vld [vmem:[#allocation3 + $0x318] sm:$0xff]   ;;  %v2025_v47 = vld [vmem:[#allocation3 + $0x360] sm:$0xff]  }
 0x15f   :  { %1855 = vmatpush3.bf16.msra.mxu0 %v1995_v48  ;;  %v2026_v48 = vld [vmem:[#allocation3 + $0x320] sm:$0xff]  }
 0x160   :  { %1877 = vmatpush3.bf16.msra.mxu1 %v1996_v49  ;;  %1856 = vmatprep.subr.bf16.mxu0 %v1997_v50  ;;  %v2027_v49 = vld [vmem:[#allocation3 + $0x368] sm:$0xff]  }
 0x161   :  { %1878 = vmatprep.subr.bf16.mxu1 %v1998_v51  ;;  %v2028_v50 = vld [vmem:[#allocation3 + $0x328] sm:$0xff]   ;;  %v2029_v51 = vld [vmem:[#allocation3 + $0x370] sm:$0xff]  }
 0x163   :  { %1857 = vmatpush3.bf16.msra.mxu0 %v1999_v52  ;;  %v2030_v52 = vld [vmem:[#allocation3 + $0x330] sm:$0xff]  }
 0x164   :  { %1879 = vmatpush3.bf16.msra.mxu1 %v2000_v53  ;;  %1858 = vmatprep.subr.bf16.mxu0 %v2001_v54  ;;  %v2031_v53 = vld [vmem:[#allocation3 + $0x378] sm:$0xff]  }
 0x165   :  { %1880 = vmatprep.subr.bf16.mxu1 %v2002_v55  ;;  %v2032_v54 = vld [vmem:[#allocation3 + $0x338] sm:$0xff]  }
 0x167   :  { %1859 = vmatpush3.bf16.msra.mxu0 %v2003_v56 }
 0x168   :  { %1881 = vmatpush3.bf16.msra.mxu1 %v2004_v57  ;;  %1860 = vmatprep.subr.bf16.mxu0 %v2005_v58 }
 0x169   :  { %1882 = vmatprep.subr.bf16.mxu1 %v2006_v59 }
 0x16b   :  { %1861 = vmatpush3.bf16.msra.mxu0 %v2007_v60 }
 0x16c   :  { %1883 = vmatpush3.bf16.msra.mxu1 %v2008_v61  ;;  %1862 = vmatprep.subr.bf16.mxu0 %v2009_v62 }
 0x16d   :  { %1884 = vmatprep.subr.bf16.mxu1 %v2010_v63  ;;  %v1743_v63 = vld [vmem:[%s2282_s1 + $0xc] ss:$0 sm:$0xff] }
 0x16f   :  { %1863 = vmatpush3.bf16.msra.mxu0 %v2011_v0 }
 0x170   :  { %1885 = vmatpush3.bf16.msra.mxu1 %v2012_v1  ;;  %1864 = vmatprep.subr.bf16.mxu0 %v2013_v2 }
 0x171   :  { %1886 = vmatprep.subr.bf16.mxu1 %v2014_v3 }
 0x173   :  { %1865 = vmatpush3.bf16.msra.mxu0 %v2015_v4 }
 0x174   :  { %1887 = vmatpush3.bf16.msra.mxu1 %v2016_v5  ;;  %1894 = vmatprep.subr.bf16.mxu0 %v2017_v6  ;;  %v1744_v5 = vld [vmem:[%s2282_s1 + $0xf] ss:$0 sm:$0xff] }
 0x229   :  { %v1822_v7 = vpop.f32.mrb[4].mxu0 }
 0x22a   :  { %v1844_v8 = vpop.f32.mrb[4].mxu1  ;;  %v1823_v9 = vpop.f32.mrb[5].mxu0 }
 0x22b   :  { %v1845_v10 = vpop.f32.mrb[5].mxu1  ;;  %v1824_v11 = vadd.f32 %v1823_v9, %v1822_v7  ;;  %v1825_v13 = vpop.f32.mrb[6].mxu0 }
 0x22c   :  { %v1846_v12 = vadd.f32 %v1845_v10, %v1844_v8  ;;  %v1847_v14 = vpop.f32.mrb[6].mxu1  ;;  %v1826_v16 = vpop.f32.mrb[7].mxu0 }
 0x22d   :  { %v1848_v17 = vpop.f32.mrb[7].mxu1  ;;  %v1827_v19 = vadd.f32 %v1826_v16, %v1825_v13 }
 0x22e   :  { %v1025_v18 = vadd.f32 %v1846_v12, %v1824_v11  ;;  %v1849_v20 = vadd.f32 %v1848_v17, %v1847_v14 }
 0x230   :  { %v1036_v22 = vmul.f32 %v1709_v15, %v1025_v18  ;;  %v1028_v23 = vadd.f32 %v1849_v20, %v1827_v19 }
 0x232   :  { %v1043_v24 = vadd.f32 %v1710_v21, %v1036_v22  ;;  %v1037_v25 = vmul.f32 %v1709_v15, %v1028_v23 }
 0x234   :  { %v1047_v26 = vmul.f32 0.01, %v1043_v24  ;;  %v1044_v27 = vadd.f32 %v1710_v21, %v1037_v25  ;;  %vm1045_vm10 = vcmp.ge.f32.partialorder %v1043_v24, 0.0 }
 0x236   :  { %vm1046_vm11 = vcmp.ge.f32.partialorder %v1044_v27, 0.0  ;;  %v1048_v28 = vmul.f32 0.01, %v1044_v27  ;;  %v1049_v29 = vsel %vm1045_vm10, %v1043_v24, %v1047_v26  ;;  %v1745_v26 = vld [vmem:[%s2282_s1 + $0x10] ss:$0 sm:$0xff] }
 0x238   :  { %v1050_v30 = vsel %vm1046_vm11, %v1044_v27, %v1048_v28 }
 0x239   :  { %v1051_v31 = vpack.c.bf16 %v1050_v30, %v1049_v29 }
 0x23b   :  { %v1053_v32 = vrot.slane %v1051_v31, 7 }
 0x23d   :  { %1055 = vst [vmem:[#allocation2] sm:$0x3e] %v1053_v32 }
 0x244   :  { %v1057_v33 = vld [vmem:[#allocation2] sm:$0x3e] }
 0x245   :  { %v1059_v34 = vld [vmem:[#allocation2] sm:$0xf8]  ;;  %v1061_v35 = vrot.slane %v1057_v33, 1 }
 0x246   :  { %v1067_v36 = vrot.slane %v1059_v34, 3  ;;  %v1058_v37 = vld [vmem:[#allocation2] sm:$0x7c] }
 0x247   :  { %v1064_v39 = vrot.slane %v1058_v37, 2  ;;  %1357 = vmatprep.mubr.bf16.mxu0 %v1061_v35  ;;  %v1056_v41 = vld [vmem:[#allocation2] sm:$0x1f] }
 0x248   :  { %1398 = vmatprep.mubr.bf16.mxu1 %v1067_v36  ;;  %1358 = vmatmul.mubr.bf16.vlgmr.msra.gmra.mrb[8].mxu0 %v1056_v41 }
 0x249   :  { %1399 = vmatmul.mubr.bf16.vlgmr.msra.gmra.mrb[8].mxu1 %v1064_v39  ;;  %1895 = vmatpush3.bf16.msra.mxu0 %v2018_v38 }
 0x24a   :  { %1896 = vmatprep.subr.bf16.mxu0 %v2019_v40 }
 0x24d   :  { %1897 = vmatpush3.bf16.msra.mxu0 %v2020_v42 }
 0x24e   :  { %1898 = vmatprep.subr.bf16.mxu0 %v2021_v43 }
 0x251   :  { %1899 = vmatpush3.bf16.msra.mxu0 %v2022_v44 }
 0x252   :  { %1900 = vmatprep.subr.bf16.mxu0 %v2023_v45 }
 0x255   :  { %1901 = vmatpush3.bf16.msra.mxu0 %v2024_v46 }
 0x256   :  { %1902 = vmatprep.subr.bf16.mxu0 %v2025_v47 }
 0x259   :  { %1903 = vmatpush3.bf16.msra.mxu0 %v2026_v48 }
 0x25a   :  { %1904 = vmatprep.subr.bf16.mxu0 %v2027_v49 }
 0x25d   :  { %1905 = vmatpush3.bf16.msra.mxu0 %v2028_v50 }
 0x25e   :  { %1906 = vmatprep.subr.bf16.mxu0 %v2029_v51 }
 0x261   :  { %1907 = vmatpush3.bf16.msra.mxu0 %v2030_v52 }
 0x262   :  { %1908 = vmatprep.subr.bf16.mxu0 %v2031_v53 }
 0x265   :  { %1909 = vmatpush3.bf16.msra.mxu0 %v2032_v54 }
 0x31b   :  { %v1866_v55 = vpop.f32.mrb[8].mxu0 }
 0x31c   :  { %v1888_v56 = vpop.f32.mrb[8].mxu1  ;;  %v1867_v57 = vpop.f32.mrb[9].mxu0 }
 0x31d   :  { %v1889_v58 = vpop.f32.mrb[9].mxu1  ;;  %v1868_v59 = vadd.f32 %v1867_v57, %v1866_v55  ;;  %v1869_v61 = vpop.f32.mrb[10].mxu0 }
 0x31e   :  { %v1890_v60 = vadd.f32 %v1889_v58, %v1888_v56  ;;  %v1891_v62 = vpop.f32.mrb[10].mxu1  ;;  %v1870_v0 = vpop.f32.mrb[11].mxu0 }
 0x31f   :  { %v1892_v1 = vpop.f32.mrb[11].mxu1  ;;  %v1871_v3 = vadd.f32 %v1870_v0, %v1869_v61 }
 0x320   :  { %v1401_v2 = vadd.f32 %v1890_v60, %v1868_v59  ;;  %v1893_v4 = vadd.f32 %v1892_v1, %v1891_v62 }
 0x322   :  { %v1412_v6 = vmul.f32 %v1743_v63, %v1401_v2  ;;  %v1404_v7 = vadd.f32 %v1893_v4, %v1871_v3 }
 0x324   :  { %v1419_v8 = vadd.f32 %v1744_v5, %v1412_v6  ;;  %v1413_v9 = vmul.f32 %v1743_v63, %v1404_v7 }
 0x326   :  { %vm1421_vm12 = vcmp.ge.f32.partialorder %v1419_v8, 0.0  ;;  %v1423_v10 = vmul.f32 0.01, %v1419_v8  ;;  %v1420_v11 = vadd.f32 %v1744_v5, %v1413_v9 }
 0x328   :  { %v1424_v12 = vmul.f32 0.01, %v1420_v11  ;;  %vm1422_vm13 = vcmp.ge.f32.partialorder %v1420_v11, 0.0  ;;  %v1425_v13 = vsel %vm1421_vm12, %v1419_v8, %v1423_v10 }
 0x329   :  { %v1428_v14 = vrot.slane %v1425_v13, 2  ;;  %v1431_v19 = vrot.slane %v1425_v13, 4 }
 0x32a   :  { %v1426_v15 = vsel %vm1422_vm13, %v1420_v11, %v1424_v12 }
 0x32b   :  { %v1435_v16 = vrot.slane %v1426_v15, 2  ;;  %v1430_v17 = vmax.f32 %v1425_v13, %v1428_v14 }
 0x32d   :  { %v1437_v18 = vmax.f32 %v1425_v13, %v1435_v16  ;;  %v1433_v21 = vmax.f32 %v1430_v17, %v1431_v19 }
 0x32f   :  { %v1438_v20 = vmax.f32 %v1437_v18, 0.0  ;;  %v1442_v24 = vpack.c.bf16 %v1433_v21, %v1433_v21 }
 0x331   :  { %v1440_v22 = vrot.slane %v1438_v20, 6 }
 0x333   :  { %v1443_v23 = vpack.c.bf16 %v1440_v22, %v1440_v22 }
 0x335   :  { %1609 = vmatprep.mubr.bf16.mxu0 %v1443_v23 }
 0x336   :  { %1610 = vmatmul.mubr.bf16.vlgmr.msra.gmra.mrb[12].mxu0 %v1442_v24 }
 0x409   :  { %v1910_v25 = vpop.f32.mrb[12].mxu0 }
 0x40a   :  { %v1911_v27 = vpop.f32.mrb[13].mxu0 }
 0x40b   :  { %v1912_v28 = vadd.f32 %v1911_v27, %v1910_v25  ;;  %v1913_v29 = vpop.f32.mrb[14].mxu0 }
 0x40c   :  { %v1914_v30 = vpop.f32.mrb[15].mxu0 }
 0x40d   :  { %v1612_v31 = vadd.f32 %v1912_v28, %v1745_v26 }
 0x40f   :  { %1617 = vst [vmem:[#allocation6] sm:$0x3] %v1612_v31 }
 0x410   :  { %2066 = shalt.err (!%p2063_p12)
}
 0x411   :  { %s2067_s1 = scalar_lea.hbm %s2284_s3, 32 }
 0x412   :  { %p2068_p13 = scmp.ne.s32.totalorder %s2284_s3, %s2067_s1  ;;  %p2071_p0 = scmp.lt.u32.totalorder %s2067_s1, %s2284_s3 }
 0x414   :  { %p2073_p1 = pnand %p2071_p0, %p2068_p13 }
 0x416   :  { %2076 = shalt.err (!%p2073_p1)
}
 0x417   :  { %1627 = dma.vmem_to_hbm [thread:$0]  %s1625_s12, 32, %s2284_s3, [#allocation5]  }
 0x418   :  { %2079 = dma.done.wait [#allocation5], 32  }
 0x419   :  { %2080 = vsyncadd [#allocation5], 4294967264 }
 0x41a   :  { %1631 = vsyncpa [#allocation4], 1 }
 0x41b   :  { %1632 = vsyncpa [#allocation5], 1 }

</bundles_post_ra>
